<compile_context>
chip_gen: v7x
topology: tpu7x:2x2x1
jax: 0.10.0
libtpu: 0.0.40
codegen_flags: <defaults>
</compile_context>

<pallas_src>
import jax
import jax.numpy as jnp
from jax.experimental import pallas as pl
from jax.experimental.pallas import tpu as pltpu

HEADS = 3
NEG_SLOPE = 0.2      # PyG GATConv default LeakyReLU slope
MASK_VAL = -1e30     # softmax mask for non-edges, used in f32 only (inside the kernel)


# ---------------------------------------------------------------------------
# Fused kernel: gat1 + relu + gat2 + relu + pair gather + MLP + sigmoid
# ---------------------------------------------------------------------------
def make_fused_kernel(n, f, s, n_ligands, out_rows):
    """Build the fused GAT_MLP forward kernel for static sizes (n nodes, f feats, s pairs)."""

    def kernel(x_ref, adj_ref, st_ref,
               w1_ref, a1_ref, b1_ref,
               w2_ref, a2_ref, b2_ref,
               fw1a_ref, fw1b_ref, fb1_ref,
               fw2_ref, fb2_ref,
               fw3_ref, fb3_ref,
               fw4_ref, fb4_ref,
               o_ref):
        # int8 adjacency (1 = edge j->i incl. self-loop, 0 = no edge) -> bool mask built
        # ONCE and reused by both layers / all heads.  MASK_VAL only ever exists in f32.
        edge_mask = adj_ref[...].astype(jnp.float32) > 0.0              # [n, n]

        def gat_layer(x_f32, w_ref_, att_ref_, bias_ref_):
            # Head-parallel projection (MXU, bf16 operands, f32 accumulation).
            xp = jnp.dot(x_f32.astype(jnp.bfloat16), w_ref_[...],
                         preferred_element_type=jnp.float32)            # [n, H*f]
            xp_bf = xp.astype(jnp.bfloat16)                             # cast ONCE, reused

            # alpha[:, h] = <xp_h, att_src_h>; alpha[:, H+h] = <xp_h, att_dst_h>.
            # One MXU matmul replaces 2*H XLU cross-lane reductions.
            alpha = jnp.dot(xp_bf, att_ref_[...],
                            preferred_element_type=jnp.float32)         # [n, 2H]
            # One XLU transpose per layer (previously one per head).
            alpha_src_t = jnp.swapaxes(alpha[:, :HEADS], 0, 1)          # [H, n]

            attn_heads = []
            for h in range(HEADS):                                      # H = 3, static unroll
                a_dst = alpha[:, HEADS + h:HEADS + h + 1]               # [n, 1]  free slice
                a_src_row = alpha_src_t[h:h + 1, :]                     # [1, n]  free slice
                # e[i, j] = LeakyReLU(alpha_dst[i] + alpha_src[j]) over edges j -> i
                e = a_dst + a_src_row                                   # [n, n] f32
                e = jnp.where(e >= 0.0, e, NEG_SLOPE * e)               # LeakyReLU
                e = jnp.where(edge_mask, e, MASK_VAL)                   # mask non-edges (f32)
                e = e - jnp.max(e, axis=-1, keepdims=True)              # self-loops => finite
                p = jnp.exp(e)                                          # masked entries -> 0
                attn_heads.append(
                    p * pl.reciprocal(jnp.sum(p, axis=-1, keepdims=True), approx=True))

            # Fuse the H per-head aggregations into ONE MXU matmul:
            #   [n, H*n] @ [H*n, f]  ==  sum_h attn_h @ xp_h
            attn_all = jnp.concatenate(attn_heads, axis=1).astype(jnp.bfloat16)   # [n, H*n]
            xp_stacked = jnp.concatenate(
                [xp_bf[:, h * f:(h + 1) * f] for h in range(HEADS)], axis=0)      # [H*n, f]
            acc = jnp.dot(attn_all, xp_stacked,
                          preferred_element_type=jnp.float32)                      # [n, f]
            out = acc * (1.0 / HEADS) + bias_ref_[...]                  # concat=False => mean
            return jnp.maximum(out, 0.0)                                # fused F.relu

        x1 = gat_layer(x_ref[...], w1_ref, a1_ref, b1_ref)
        x2 = gat_layer(x1, w2_ref, a2_ref, b2_ref)

        # ---- pair gather: ONE stacked one-hot MXU matmul ([2s, n] @ [n, f]) ----
        st = st_ref[...]                                                # [s, 2] int32
        idx = jnp.concatenate([st[:, 0:1], st[:, 1:2] + n_ligands], axis=0)   # [2s, 1]
        col = jax.lax.broadcasted_iota(jnp.int32, (2 * s, n), 1)
        sel = jnp.where(col == idx, 1.0, 0.0).astype(jnp.bfloat16)             # [2s, n]
        gathered = jnp.dot(sel, x2.astype(jnp.bfloat16),
                           preferred_element_type=jnp.float32)                 # [2s, f]
        lig = gathered[:s]                                              # free sublane slices
        rec = gathered[s:]

        # ---- 4-layer MLP; fc1 weight is pre-split so concat([lig, rec]) is not needed ----
        h1 = (jnp.dot(lig.astype(jnp.bfloat16), fw1a_ref[...],
                      preferred_element_type=jnp.float32)
              + jnp.dot(rec.astype(jnp.bfloat16), fw1b_ref[...],
                        preferred_element_type=jnp.float32)
              + fb1_ref[...])
        h1 = jnp.maximum(h1, 0.0)
        h2 = jnp.maximum(
            jnp.dot(h1.astype(jnp.bfloat16), fw2_ref[...],
                    preferred_element_type=jnp.float32) + fb2_ref[...], 0.0)
        h3 = jnp.maximum(
            jnp.dot(h2.astype(jnp.bfloat16), fw3_ref[...],
                    preferred_element_type=jnp.float32) + fb3_ref[...], 0.0)

        # fc4 as an NT matmul: logits come out lane-dense as [1, s] (no output transpose).
        logits_row = jnp.einsum('ok,sk->os', fw4_ref[...], h3.astype(jnp.bfloat16),
                                preferred_element_type=jnp.float32) + fb4_ref[...]
        probs_row = jax.nn.sigmoid(logits_row)                          # [1, s] f32

        pad = out_rows * 128 - s
        if pad > 0:
            probs_row = jnp.concatenate(
                [probs_row, jnp.zeros((1, pad), jnp.float32)], axis=1)
        # Lane-dense unmasked store, 1/128 of the bytes of the old broadcast scheme.
        o_ref[...] = probs_row.reshape(out_rows, 128)

    return kernel


# ---------------------------------------------------------------------------
# Host-side one-time parameter prep (block-diag att matrices, fc1 split, fc4.T, bf16 cast)
# ---------------------------------------------------------------------------
def prepare_params(params):
    g1, g2, mlp = params

    def prep_gat(g):
        w, att_src, att_dst, bias = g
        f = att_src.shape[1]
        att_block = jnp.zeros((HEADS * f, 2 * HEADS), jnp.float32)
        for h in range(HEADS):
            att_block = att_block.at[h * f:(h + 1) * f, h].set(att_src[h])
            att_block = att_block.at[h * f:(h + 1) * f, HEADS + h].set(att_dst[h])
        return (w.astype(jnp.bfloat16), att_block.astype(jnp.bfloat16), bias)

    w1, b1, w2, b2, w3, b3, w4, b4 = mlp
    f = w1.shape[0] // 2
    mlp_prep = (w1[:f].astype(jnp.bfloat16), w1[f:].astype(jnp.bfloat16), b1,
                w2.astype(jnp.bfloat16), b2,
                w3.astype(jnp.bfloat16), b3,
                w4.T.astype(jnp.bfloat16), b4)       # fc4 transposed host-side -> [1, 64]
    return prep_gat(g1) + prep_gat(g2) + mlp_prep


def gat_mlp_forward(feature, adj_mask, sample_train, n_ligands, params):
    """Full forward pass of GAT_MLP as one fused Pallas kernel."""
    n, f = feature.shape
    s = sample_train.shape[0]
    out_rows = pl.cdiv(s, 128)
    prepared = prepare_params(params)
    kernel = make_fused_kernel(n, f, s, n_ligands, out_rows)
    vmem = pl.BlockSpec(memory_space=pltpu.MemorySpace.VMEM)
    out = pl.pallas_call(
        kernel,
        out_shape=jax.ShapeDtypeStruct((out_rows, 128), jnp.float32),
        in_specs=[vmem] * (3 + len(prepared)),
        out_specs=vmem,
    )(feature, adj_mask.astype(jnp.int8), sample_train.astype(jnp.int32), *prepared)
    return out.reshape(-1)[:s].reshape(s, 1)


# ---------------------------------------------------------------------------
# Deterministic parameter / input construction
# ---------------------------------------------------------------------------
def init_params(key, f):
    keys = jax.random.split(key, 20)
    k = iter(keys)

    def rnd(shape, scale=0.1):
        return (jax.random.normal(next(k), shape) * scale).astype(jnp.float32)

    def gat_params():
        w = rnd((f, HEADS * f))          # lin (no bias, like PyG GATConv)
        att_src = rnd((HEADS, f))
        att_dst = rnd((HEADS, f))
        bias = rnd((1, f))               # bias of size out_channels (concat=False)
        return (w, att_src, att_dst, bias)

    g1 = gat_params()
    g2 = gat_params()
    mlp = (
        rnd((2 * f, 1024)), rnd((1, 1024)),
        rnd((1024, 256)),   rnd((1, 256)),
        rnd((256, 64)),     rnd((1, 64)),
        rnd((64, 1)),       rnd((1, 1)),
    )
    return (g1, g2, mlp)


def build_adj_mask(edge_index, n):
    """int8 adjacency: 1 where edge j -> i exists (plus self-loops), 0 elsewhere."""
    src, dst = edge_index[0], edge_index[1]
    adj = jnp.zeros((n, n), jnp.int8).at[dst, src].set(1)
    adj = adj.at[jnp.arange(n), jnp.arange(n)].set(1)     # GATConv add_self_loops=True
    return adj


if __name__ == "__main__":
    key = jax.random.PRNGKey(0)
    k_feat, k_param = jax.random.split(key, 2)

    # Small synthetic sizes consistent with the module:
    #   F = min(L_R_fea.shape) = PCA dim = 16, N_L ligands + N_R receptors = 16 nodes.
    F = 16
    N_L, N_R = 8, 8
    N = N_L + N_R
    S = 8  # number of training pairs

    feature = jax.random.normal(k_feat, (N, F), dtype=jnp.float32)

    # Deterministic bipartite edge_index (both directions), ligand l <-> receptor N_L + r
    src_list, dst_list = [], []
    for l in range(N_L):
        for r in range(N_R):
            if (l + r) % 2 == 0:
                src_list += [l, N_L + r]
                dst_list += [N_L + r, l]
    edge_index = jnp.array([src_list, dst_list], dtype=jnp.int32)   # [2, E]
    adj_mask = build_adj_mask(edge_index, N)

    # training pairs (ligand_idx, receptor_idx)
    sample_train = jnp.array([[i % N_L, (2 * i + 1) % N_R] for i in range(S)],
                             dtype=jnp.int32)

    params = init_params(k_param, F)

    out = gat_mlp_forward(feature, adj_mask, sample_train, N_L, params)
    out = jax.block_until_ready(out)

    assert out.shape == (S, 1)
    assert bool(jnp.all(jnp.isfinite(out)))
    assert bool(jnp.all((out >= 0.0) & (out <= 1.0)))
    print("KERNEL_OK")
</pallas_src>

<mosaic_0001>
module attributes {stable_mosaic.version = 11 : i64} {
  func.func @kernel(%arg0: memref<16x16xf32, #tpu.memory_space<vmem>>, %arg1: memref<16x16xi8, #tpu.memory_space<vmem>>, %arg2: memref<8x2xi32, #tpu.memory_space<vmem>>, %arg3: memref<16x48xbf16, #tpu.memory_space<vmem>>, %arg4: memref<48x6xbf16, #tpu.memory_space<vmem>>, %arg5: memref<1x16xf32, #tpu.memory_space<vmem>>, %arg6: memref<16x48xbf16, #tpu.memory_space<vmem>>, %arg7: memref<48x6xbf16, #tpu.memory_space<vmem>>, %arg8: memref<1x16xf32, #tpu.memory_space<vmem>>, %arg9: memref<16x1024xbf16, #tpu.memory_space<vmem>>, %arg10: memref<16x1024xbf16, #tpu.memory_space<vmem>>, %arg11: memref<1x1024xf32, #tpu.memory_space<vmem>>, %arg12: memref<1024x256xbf16, #tpu.memory_space<vmem>>, %arg13: memref<1x256xf32, #tpu.memory_space<vmem>>, %arg14: memref<256x64xbf16, #tpu.memory_space<vmem>>, %arg15: memref<1x64xf32, #tpu.memory_space<vmem>>, %arg16: memref<1x64xbf16, #tpu.memory_space<vmem>>, %arg17: memref<1x1xf32, #tpu.memory_space<vmem>>, %arg18: memref<1x128xf32, #tpu.memory_space<vmem>>) attributes {dimension_semantics = [], scalar_prefetch = 0 : i64, scratch_operands = 0 : i64, tpu.core_type = #tpu.core_type<tc>} {
    %c0 = arith.constant 0 : index
    %c0_0 = arith.constant 0 : index
    %0 = vector.load %arg1[%c0, %c0_0] : memref<16x16xi8, #tpu.memory_space<vmem>>, vector<16x16xi8>
    %1 = arith.sitofp %0 : vector<16x16xi8> to vector<16x16xf32>
    %cst = arith.constant 0.000000e+00 : f32
    %2 = vector.broadcast %cst : f32 to vector<16x16xf32>
    %3 = arith.cmpf ogt, %1, %2 : vector<16x16xf32>
    %c0_1 = arith.constant 0 : index
    %c0_2 = arith.constant 0 : index
    %4 = vector.load %arg0[%c0_1, %c0_2] : memref<16x16xf32, #tpu.memory_space<vmem>>, vector<16x16xf32>
    %5 = arith.truncf %4 : vector<16x16xf32> to vector<16x16xbf16>
    %c0_3 = arith.constant 0 : index
    %c0_4 = arith.constant 0 : index
    %6 = vector.load %arg3[%c0_3, %c0_4] : memref<16x48xbf16, #tpu.memory_space<vmem>>, vector<16x48xbf16>
    %cst_5 = arith.constant dense<0.000000e+00> : vector<16x48xf32>
    %7 = tpu.matmul %5, %6, %cst_5 {dimension_numbers = #tpu.dot_dimension_numbers<[1], [0], [0], [1], [0, 0, 1, 1], [], []>} : vector<16x16xbf16>, vector<16x48xbf16>, vector<16x48xf32> -> vector<16x48xf32>
    %8 = arith.truncf %7 : vector<16x48xf32> to vector<16x48xbf16>
    %c0_6 = arith.constant 0 : index
    %c0_7 = arith.constant 0 : index
    %9 = vector.load %arg4[%c0_6, %c0_7] : memref<48x6xbf16, #tpu.memory_space<vmem>>, vector<48x6xbf16>
    %cst_8 = arith.constant dense<0.000000e+00> : vector<16x6xf32>
    %10 = tpu.matmul %8, %9, %cst_8 {dimension_numbers = #tpu.dot_dimension_numbers<[1], [0], [0], [1], [0, 0, 1, 1], [], []>} : vector<16x48xbf16>, vector<48x6xbf16>, vector<16x6xf32> -> vector<16x6xf32>
    %11 = vector.extract_strided_slice %10 {offsets = [0, 0], sizes = [16, 3], strides = [1, 1]} : vector<16x6xf32> to vector<16x3xf32>
    %12 = tpu.transpose %11, [1, 0] : vector<16x3xf32> -> vector<3x16xf32>
    %13 = vector.extract_strided_slice %10 {offsets = [0, 3], sizes = [16, 1], strides = [1, 1]} : vector<16x6xf32> to vector<16x1xf32>
    %14 = vector.extract_strided_slice %12 {offsets = [0, 0], sizes = [1, 16], strides = [1, 1]} : vector<3x16xf32> to vector<1x16xf32>
    %15 = vector.broadcast %13 : vector<16x1xf32> to vector<16x16xf32>
    %16 = vector.broadcast %14 : vector<1x16xf32> to vector<16x16xf32>
    %17 = arith.addf %15, %16 : vector<16x16xf32>
    %cst_9 = arith.constant 0.000000e+00 : f32
    %18 = vector.broadcast %cst_9 : f32 to vector<16x16xf32>
    %19 = arith.cmpf oge, %17, %18 : vector<16x16xf32>
    %cst_10 = arith.constant 2.000000e-01 : f32
    %20 = vector.broadcast %cst_10 : f32 to vector<16x16xf32>
    %21 = arith.mulf %20, %17 : vector<16x16xf32>
    %22 = arith.select %19, %17, %21 : vector<16x16xi1>, vector<16x16xf32>
    %cst_11 = arith.constant -1.000000e+30 : f32
    %23 = vector.broadcast %cst_11 : f32 to vector<16x16xf32>
    %24 = arith.select %3, %22, %23 : vector<16x16xi1>, vector<16x16xf32>
    %cst_12 = arith.constant dense<0xFF800000> : vector<16xf32>
    %25 = vector.multi_reduction <maximumf>, %24, %cst_12 [1] : vector<16x16xf32> to vector<16xf32>
    %26 = vector.shape_cast %25 : vector<16xf32> to vector<16x1xf32>
    %27 = vector.broadcast %26 : vector<16x1xf32> to vector<16x16xf32>
    %28 = arith.subf %24, %27 : vector<16x16xf32>
    %29 = math.exp %28 : vector<16x16xf32>
    %cst_13 = arith.constant dense<0.000000e+00> : vector<16xf32>
    %30 = vector.multi_reduction <add>, %29, %cst_13 [1] : vector<16x16xf32> to vector<16xf32>
    %31 = vector.shape_cast %30 : vector<16xf32> to vector<16x1xf32>
    %32 = tpu.reciprocal %31 {approx = true} : vector<16x1xf32> -> vector<16x1xf32>
    %33 = vector.broadcast %32 : vector<16x1xf32> to vector<16x16xf32>
    %34 = arith.mulf %29, %33 : vector<16x16xf32>
    %35 = vector.extract_strided_slice %10 {offsets = [0, 4], sizes = [16, 1], strides = [1, 1]} : vector<16x6xf32> to vector<16x1xf32>
    %36 = vector.extract_strided_slice %12 {offsets = [1, 0], sizes = [1, 16], strides = [1, 1]} : vector<3x16xf32> to vector<1x16xf32>
    %37 = vector.broadcast %35 : vector<16x1xf32> to vector<16x16xf32>
    %38 = vector.broadcast %36 : vector<1x16xf32> to vector<16x16xf32>
    %39 = arith.addf %37, %38 : vector<16x16xf32>
    %cst_14 = arith.constant 0.000000e+00 : f32
    %40 = vector.broadcast %cst_14 : f32 to vector<16x16xf32>
    %41 = arith.cmpf oge, %39, %40 : vector<16x16xf32>
    %cst_15 = arith.constant 2.000000e-01 : f32
    %42 = vector.broadcast %cst_15 : f32 to vector<16x16xf32>
    %43 = arith.mulf %42, %39 : vector<16x16xf32>
    %44 = arith.select %41, %39, %43 : vector<16x16xi1>, vector<16x16xf32>
    %cst_16 = arith.constant -1.000000e+30 : f32
    %45 = vector.broadcast %cst_16 : f32 to vector<16x16xf32>
    %46 = arith.select %3, %44, %45 : vector<16x16xi1>, vector<16x16xf32>
    %cst_17 = arith.constant dense<0xFF800000> : vector<16xf32>
    %47 = vector.multi_reduction <maximumf>, %46, %cst_17 [1] : vector<16x16xf32> to vector<16xf32>
    %48 = vector.shape_cast %47 : vector<16xf32> to vector<16x1xf32>
    %49 = vector.broadcast %48 : vector<16x1xf32> to vector<16x16xf32>
    %50 = arith.subf %46, %49 : vector<16x16xf32>
    %51 = math.exp %50 : vector<16x16xf32>
    %cst_18 = arith.constant dense<0.000000e+00> : vector<16xf32>
    %52 = vector.multi_reduction <add>, %51, %cst_18 [1] : vector<16x16xf32> to vector<16xf32>
    %53 = vector.shape_cast %52 : vector<16xf32> to vector<16x1xf32>
    %54 = tpu.reciprocal %53 {approx = true} : vector<16x1xf32> -> vector<16x1xf32>
    %55 = vector.broadcast %54 : vector<16x1xf32> to vector<16x16xf32>
    %56 = arith.mulf %51, %55 : vector<16x16xf32>
    %57 = vector.extract_strided_slice %10 {offsets = [0, 5], sizes = [16, 1], strides = [1, 1]} : vector<16x6xf32> to vector<16x1xf32>
    %58 = vector.extract_strided_slice %12 {offsets = [2, 0], sizes = [1, 16], strides = [1, 1]} : vector<3x16xf32> to vector<1x16xf32>
    %59 = vector.broadcast %57 : vector<16x1xf32> to vector<16x16xf32>
    %60 = vector.broadcast %58 : vector<1x16xf32> to vector<16x16xf32>
    %61 = arith.addf %59, %60 : vector<16x16xf32>
    %cst_19 = arith.constant 0.000000e+00 : f32
    %62 = vector.broadcast %cst_19 : f32 to vector<16x16xf32>
    %63 = arith.cmpf oge, %61, %62 : vector<16x16xf32>
    %cst_20 = arith.constant 2.000000e-01 : f32
    %64 = vector.broadcast %cst_20 : f32 to vector<16x16xf32>
    %65 = arith.mulf %64, %61 : vector<16x16xf32>
    %66 = arith.select %63, %61, %65 : vector<16x16xi1>, vector<16x16xf32>
    %cst_21 = arith.constant -1.000000e+30 : f32
    %67 = vector.broadcast %cst_21 : f32 to vector<16x16xf32>
    %68 = arith.select %3, %66, %67 : vector<16x16xi1>, vector<16x16xf32>
    %cst_22 = arith.constant dense<0xFF800000> : vector<16xf32>
    %69 = vector.multi_reduction <maximumf>, %68, %cst_22 [1] : vector<16x16xf32> to vector<16xf32>
    %70 = vector.shape_cast %69 : vector<16xf32> to vector<16x1xf32>
    %71 = vector.broadcast %70 : vector<16x1xf32> to vector<16x16xf32>
    %72 = arith.subf %68, %71 : vector<16x16xf32>
    %73 = math.exp %72 : vector<16x16xf32>
    %cst_23 = arith.constant dense<0.000000e+00> : vector<16xf32>
    %74 = vector.multi_reduction <add>, %73, %cst_23 [1] : vector<16x16xf32> to vector<16xf32>
    %75 = vector.shape_cast %74 : vector<16xf32> to vector<16x1xf32>
    %76 = tpu.reciprocal %75 {approx = true} : vector<16x1xf32> -> vector<16x1xf32>
    %77 = vector.broadcast %76 : vector<16x1xf32> to vector<16x16xf32>
    %78 = arith.mulf %73, %77 : vector<16x16xf32>
    %79 = tpu.concatenate %34, %56, %78 in 1 : vector<16x16xf32>, vector<16x16xf32>, vector<16x16xf32> -> vector<16x48xf32>
    %80 = arith.truncf %79 : vector<16x48xf32> to vector<16x48xbf16>
    %81 = vector.extract_strided_slice %8 {offsets = [0, 0], sizes = [16, 16], strides = [1, 1]} : vector<16x48xbf16> to vector<16x16xbf16>
    %82 = vector.extract_strided_slice %8 {offsets = [0, 16], sizes = [16, 16], strides = [1, 1]} : vector<16x48xbf16> to vector<16x16xbf16>
    %83 = vector.extract_strided_slice %8 {offsets = [0, 32], sizes = [16, 16], strides = [1, 1]} : vector<16x48xbf16> to vector<16x16xbf16>
    %84 = tpu.concatenate %81, %82, %83 in 0 : vector<16x16xbf16>, vector<16x16xbf16>, vector<16x16xbf16> -> vector<48x16xbf16>
    %cst_24 = arith.constant dense<0.000000e+00> : vector<16x16xf32>
    %85 = tpu.matmul %80, %84, %cst_24 {dimension_numbers = #tpu.dot_dimension_numbers<[1], [0], [0], [1], [0, 0, 1, 1], [], []>} : vector<16x48xbf16>, vector<48x16xbf16>, vector<16x16xf32> -> vector<16x16xf32>
    %cst_25 = arith.constant 0.333333343 : f32
    %86 = vector.broadcast %cst_25 : f32 to vector<16x16xf32>
    %87 = arith.mulf %85, %86 : vector<16x16xf32>
    %c0_26 = arith.constant 0 : index
    %c0_27 = arith.constant 0 : index
    %88 = vector.load %arg5[%c0_26, %c0_27] : memref<1x16xf32, #tpu.memory_space<vmem>>, vector<1x16xf32>
    %89 = vector.broadcast %88 : vector<1x16xf32> to vector<16x16xf32>
    %90 = arith.addf %87, %89 : vector<16x16xf32>
    %cst_28 = arith.constant 0.000000e+00 : f32
    %91 = vector.broadcast %cst_28 : f32 to vector<16x16xf32>
    %92 = arith.maximumf %90, %91 : vector<16x16xf32>
    %93 = arith.truncf %92 : vector<16x16xf32> to vector<16x16xbf16>
    %c0_29 = arith.constant 0 : index
    %c0_30 = arith.constant 0 : index
    %94 = vector.load %arg6[%c0_29, %c0_30] : memref<16x48xbf16, #tpu.memory_space<vmem>>, vector<16x48xbf16>
    %cst_31 = arith.constant dense<0.000000e+00> : vector<16x48xf32>
    %95 = tpu.matmul %93, %94, %cst_31 {dimension_numbers = #tpu.dot_dimension_numbers<[1], [0], [0], [1], [0, 0, 1, 1], [], []>} : vector<16x16xbf16>, vector<16x48xbf16>, vector<16x48xf32> -> vector<16x48xf32>
    %96 = arith.truncf %95 : vector<16x48xf32> to vector<16x48xbf16>
    %c0_32 = arith.constant 0 : index
    %c0_33 = arith.constant 0 : index
    %97 = vector.load %arg7[%c0_32, %c0_33] : memref<48x6xbf16, #tpu.memory_space<vmem>>, vector<48x6xbf16>
    %cst_34 = arith.constant dense<0.000000e+00> : vector<16x6xf32>
    %98 = tpu.matmul %96, %97, %cst_34 {dimension_numbers = #tpu.dot_dimension_numbers<[1], [0], [0], [1], [0, 0, 1, 1], [], []>} : vector<16x48xbf16>, vector<48x6xbf16>, vector<16x6xf32> -> vector<16x6xf32>
    %99 = vector.extract_strided_slice %98 {offsets = [0, 0], sizes = [16, 3], strides = [1, 1]} : vector<16x6xf32> to vector<16x3xf32>
    %100 = tpu.transpose %99, [1, 0] : vector<16x3xf32> -> vector<3x16xf32>
    %101 = vector.extract_strided_slice %98 {offsets = [0, 3], sizes = [16, 1], strides = [1, 1]} : vector<16x6xf32> to vector<16x1xf32>
    %102 = vector.extract_strided_slice %100 {offsets = [0, 0], sizes = [1, 16], strides = [1, 1]} : vector<3x16xf32> to vector<1x16xf32>
    %103 = vector.broadcast %101 : vector<16x1xf32> to vector<16x16xf32>
    %104 = vector.broadcast %102 : vector<1x16xf32> to vector<16x16xf32>
    %105 = arith.addf %103, %104 : vector<16x16xf32>
    %cst_35 = arith.constant 0.000000e+00 : f32
    %106 = vector.broadcast %cst_35 : f32 to vector<16x16xf32>
    %107 = arith.cmpf oge, %105, %106 : vector<16x16xf32>
    %cst_36 = arith.constant 2.000000e-01 : f32
    %108 = vector.broadcast %cst_36 : f32 to vector<16x16xf32>
    %109 = arith.mulf %108, %105 : vector<16x16xf32>
    %110 = arith.select %107, %105, %109 : vector<16x16xi1>, vector<16x16xf32>
    %cst_37 = arith.constant -1.000000e+30 : f32
    %111 = vector.broadcast %cst_37 : f32 to vector<16x16xf32>
    %112 = arith.select %3, %110, %111 : vector<16x16xi1>, vector<16x16xf32>
    %cst_38 = arith.constant dense<0xFF800000> : vector<16xf32>
    %113 = vector.multi_reduction <maximumf>, %112, %cst_38 [1] : vector<16x16xf32> to vector<16xf32>
    %114 = vector.shape_cast %113 : vector<16xf32> to vector<16x1xf32>
    %115 = vector.broadcast %114 : vector<16x1xf32> to vector<16x16xf32>
    %116 = arith.subf %112, %115 : vector<16x16xf32>
    %117 = math.exp %116 : vector<16x16xf32>
    %cst_39 = arith.constant dense<0.000000e+00> : vector<16xf32>
    %118 = vector.multi_reduction <add>, %117, %cst_39 [1] : vector<16x16xf32> to vector<16xf32>
    %119 = vector.shape_cast %118 : vector<16xf32> to vector<16x1xf32>
    %120 = tpu.reciprocal %119 {approx = true} : vector<16x1xf32> -> vector<16x1xf32>
    %121 = vector.broadcast %120 : vector<16x1xf32> to vector<16x16xf32>
    %122 = arith.mulf %117, %121 : vector<16x16xf32>
    %123 = vector.extract_strided_slice %98 {offsets = [0, 4], sizes = [16, 1], strides = [1, 1]} : vector<16x6xf32> to vector<16x1xf32>
    %124 = vector.extract_strided_slice %100 {offsets = [1, 0], sizes = [1, 16], strides = [1, 1]} : vector<3x16xf32> to vector<1x16xf32>
    %125 = vector.broadcast %123 : vector<16x1xf32> to vector<16x16xf32>
    %126 = vector.broadcast %124 : vector<1x16xf32> to vector<16x16xf32>
    %127 = arith.addf %125, %126 : vector<16x16xf32>
    %cst_40 = arith.constant 0.000000e+00 : f32
    %128 = vector.broadcast %cst_40 : f32 to vector<16x16xf32>
    %129 = arith.cmpf oge, %127, %128 : vector<16x16xf32>
    %cst_41 = arith.constant 2.000000e-01 : f32
    %130 = vector.broadcast %cst_41 : f32 to vector<16x16xf32>
    %131 = arith.mulf %130, %127 : vector<16x16xf32>
    %132 = arith.select %129, %127, %131 : vector<16x16xi1>, vector<16x16xf32>
    %cst_42 = arith.constant -1.000000e+30 : f32
    %133 = vector.broadcast %cst_42 : f32 to vector<16x16xf32>
    %134 = arith.select %3, %132, %133 : vector<16x16xi1>, vector<16x16xf32>
    %cst_43 = arith.constant dense<0xFF800000> : vector<16xf32>
    %135 = vector.multi_reduction <maximumf>, %134, %cst_43 [1] : vector<16x16xf32> to vector<16xf32>
    %136 = vector.shape_cast %135 : vector<16xf32> to vector<16x1xf32>
    %137 = vector.broadcast %136 : vector<16x1xf32> to vector<16x16xf32>
    %138 = arith.subf %134, %137 : vector<16x16xf32>
    %139 = math.exp %138 : vector<16x16xf32>
    %cst_44 = arith.constant dense<0.000000e+00> : vector<16xf32>
    %140 = vector.multi_reduction <add>, %139, %cst_44 [1] : vector<16x16xf32> to vector<16xf32>
    %141 = vector.shape_cast %140 : vector<16xf32> to vector<16x1xf32>
    %142 = tpu.reciprocal %141 {approx = true} : vector<16x1xf32> -> vector<16x1xf32>
    %143 = vector.broadcast %142 : vector<16x1xf32> to vector<16x16xf32>
    %144 = arith.mulf %139, %143 : vector<16x16xf32>
    %145 = vector.extract_strided_slice %98 {offsets = [0, 5], sizes = [16, 1], strides = [1, 1]} : vector<16x6xf32> to vector<16x1xf32>
    %146 = vector.extract_strided_slice %100 {offsets = [2, 0], sizes = [1, 16], strides = [1, 1]} : vector<3x16xf32> to vector<1x16xf32>
    %147 = vector.broadcast %145 : vector<16x1xf32> to vector<16x16xf32>
    %148 = vector.broadcast %146 : vector<1x16xf32> to vector<16x16xf32>
    %149 = arith.addf %147, %148 : vector<16x16xf32>
    %cst_45 = arith.constant 0.000000e+00 : f32
    %150 = vector.broadcast %cst_45 : f32 to vector<16x16xf32>
    %151 = arith.cmpf oge, %149, %150 : vector<16x16xf32>
    %cst_46 = arith.constant 2.000000e-01 : f32
    %152 = vector.broadcast %cst_46 : f32 to vector<16x16xf32>
    %153 = arith.mulf %152, %149 : vector<16x16xf32>
    %154 = arith.select %151, %149, %153 : vector<16x16xi1>, vector<16x16xf32>
    %cst_47 = arith.constant -1.000000e+30 : f32
    %155 = vector.broadcast %cst_47 : f32 to vector<16x16xf32>
    %156 = arith.select %3, %154, %155 : vector<16x16xi1>, vector<16x16xf32>
    %cst_48 = arith.constant dense<0xFF800000> : vector<16xf32>
    %157 = vector.multi_reduction <maximumf>, %156, %cst_48 [1] : vector<16x16xf32> to vector<16xf32>
    %158 = vector.shape_cast %157 : vector<16xf32> to vector<16x1xf32>
    %159 = vector.broadcast %158 : vector<16x1xf32> to vector<16x16xf32>
    %160 = arith.subf %156, %159 : vector<16x16xf32>
    %161 = math.exp %160 : vector<16x16xf32>
    %cst_49 = arith.constant dense<0.000000e+00> : vector<16xf32>
    %162 = vector.multi_reduction <add>, %161, %cst_49 [1] : vector<16x16xf32> to vector<16xf32>
    %163 = vector.shape_cast %162 : vector<16xf32> to vector<16x1xf32>
    %164 = tpu.reciprocal %163 {approx = true} : vector<16x1xf32> -> vector<16x1xf32>
    %165 = vector.broadcast %164 : vector<16x1xf32> to vector<16x16xf32>
    %166 = arith.mulf %161, %165 : vector<16x16xf32>
    %167 = tpu.concatenate %122, %144, %166 in 1 : vector<16x16xf32>, vector<16x16xf32>, vector<16x16xf32> -> vector<16x48xf32>
    %168 = arith.truncf %167 : vector<16x48xf32> to vector<16x48xbf16>
    %169 = vector.extract_strided_slice %96 {offsets = [0, 0], sizes = [16, 16], strides = [1, 1]} : vector<16x48xbf16> to vector<16x16xbf16>
    %170 = vector.extract_strided_slice %96 {offsets = [0, 16], sizes = [16, 16], strides = [1, 1]} : vector<16x48xbf16> to vector<16x16xbf16>
    %171 = vector.extract_strided_slice %96 {offsets = [0, 32], sizes = [16, 16], strides = [1, 1]} : vector<16x48xbf16> to vector<16x16xbf16>
    %172 = tpu.concatenate %169, %170, %171 in 0 : vector<16x16xbf16>, vector<16x16xbf16>, vector<16x16xbf16> -> vector<48x16xbf16>
    %cst_50 = arith.constant dense<0.000000e+00> : vector<16x16xf32>
    %173 = tpu.matmul %168, %172, %cst_50 {dimension_numbers = #tpu.dot_dimension_numbers<[1], [0], [0], [1], [0, 0, 1, 1], [], []>} : vector<16x48xbf16>, vector<48x16xbf16>, vector<16x16xf32> -> vector<16x16xf32>
    %cst_51 = arith.constant 0.333333343 : f32
    %174 = vector.broadcast %cst_51 : f32 to vector<16x16xf32>
    %175 = arith.mulf %173, %174 : vector<16x16xf32>
    %c0_52 = arith.constant 0 : index
    %c0_53 = arith.constant 0 : index
    %176 = vector.load %arg8[%c0_52, %c0_53] : memref<1x16xf32, #tpu.memory_space<vmem>>, vector<1x16xf32>
    %177 = vector.broadcast %176 : vector<1x16xf32> to vector<16x16xf32>
    %178 = arith.addf %175, %177 : vector<16x16xf32>
    %cst_54 = arith.constant 0.000000e+00 : f32
    %179 = vector.broadcast %cst_54 : f32 to vector<16x16xf32>
    %180 = arith.maximumf %178, %179 : vector<16x16xf32>
    %c0_55 = arith.constant 0 : index
    %c0_56 = arith.constant 0 : index
    %181 = vector.load %arg2[%c0_55, %c0_56] : memref<8x2xi32, #tpu.memory_space<vmem>>, vector<8x2xi32>
    %182 = vector.extract_strided_slice %181 {offsets = [0, 0], sizes = [8, 1], strides = [1, 1]} : vector<8x2xi32> to vector<8x1xi32>
    %183 = vector.extract_strided_slice %181 {offsets = [0, 1], sizes = [8, 1], strides = [1, 1]} : vector<8x2xi32> to vector<8x1xi32>
    %c8_i32 = arith.constant 8 : i32
    %184 = vector.broadcast %c8_i32 : i32 to vector<8x1xi32>
    %185 = arith.addi %183, %184 : vector<8x1xi32>
    %186 = tpu.concatenate %182, %185 in 0 : vector<8x1xi32>, vector<8x1xi32> -> vector<16x1xi32>
    %187 = tpu.iota {dimensions = array<i32: 1>} : vector<16x16xi32>
    %188 = vector.broadcast %186 : vector<16x1xi32> to vector<16x16xi32>
    %189 = arith.cmpi eq, %187, %188 : vector<16x16xi32>
    %cst_57 = arith.constant 1.000000e+00 : f32
    %cst_58 = arith.constant 0.000000e+00 : f32
    %190 = vector.broadcast %cst_57 : f32 to vector<16x16xf32>
    %191 = vector.broadcast %cst_58 : f32 to vector<16x16xf32>
    %192 = arith.select %189, %190, %191 : vector<16x16xi1>, vector<16x16xf32>
    %193 = arith.truncf %192 : vector<16x16xf32> to vector<16x16xbf16>
    %194 = arith.truncf %180 : vector<16x16xf32> to vector<16x16xbf16>
    %cst_59 = arith.constant dense<0.000000e+00> : vector<16x16xf32>
    %195 = tpu.matmul %193, %194, %cst_59 {dimension_numbers = #tpu.dot_dimension_numbers<[1], [0], [0], [1], [0, 0, 1, 1], [], []>} : vector<16x16xbf16>, vector<16x16xbf16>, vector<16x16xf32> -> vector<16x16xf32>
    %196 = vector.extract_strided_slice %195 {offsets = [0, 0], sizes = [8, 16], strides = [1, 1]} : vector<16x16xf32> to vector<8x16xf32>
    %197 = vector.extract_strided_slice %195 {offsets = [8, 0], sizes = [8, 16], strides = [1, 1]} : vector<16x16xf32> to vector<8x16xf32>
    %198 = arith.truncf %196 : vector<8x16xf32> to vector<8x16xbf16>
    %c0_60 = arith.constant 0 : index
    %c0_61 = arith.constant 0 : index
    %199 = vector.load %arg9[%c0_60, %c0_61] : memref<16x1024xbf16, #tpu.memory_space<vmem>>, vector<16x1024xbf16>
    %cst_62 = arith.constant dense<0.000000e+00> : vector<8x1024xf32>
    %200 = tpu.matmul %198, %199, %cst_62 {dimension_numbers = #tpu.dot_dimension_numbers<[1], [0], [0], [1], [0, 0, 1, 1], [], []>} : vector<8x16xbf16>, vector<16x1024xbf16>, vector<8x1024xf32> -> vector<8x1024xf32>
    %201 = arith.truncf %197 : vector<8x16xf32> to vector<8x16xbf16>
    %c0_63 = arith.constant 0 : index
    %c0_64 = arith.constant 0 : index
    %202 = vector.load %arg10[%c0_63, %c0_64] : memref<16x1024xbf16, #tpu.memory_space<vmem>>, vector<16x1024xbf16>
    %cst_65 = arith.constant dense<0.000000e+00> : vector<8x1024xf32>
    %203 = tpu.matmul %201, %202, %cst_65 {dimension_numbers = #tpu.dot_dimension_numbers<[1], [0], [0], [1], [0, 0, 1, 1], [], []>} : vector<8x16xbf16>, vector<16x1024xbf16>, vector<8x1024xf32> -> vector<8x1024xf32>
    %204 = arith.addf %200, %203 : vector<8x1024xf32>
    %c0_66 = arith.constant 0 : index
    %c0_67 = arith.constant 0 : index
    %205 = vector.load %arg11[%c0_66, %c0_67] : memref<1x1024xf32, #tpu.memory_space<vmem>>, vector<1x1024xf32>
    %206 = vector.broadcast %205 : vector<1x1024xf32> to vector<8x1024xf32>
    %207 = arith.addf %204, %206 : vector<8x1024xf32>
    %cst_68 = arith.constant 0.000000e+00 : f32
    %208 = vector.broadcast %cst_68 : f32 to vector<8x1024xf32>
    %209 = arith.maximumf %207, %208 : vector<8x1024xf32>
    %210 = arith.truncf %209 : vector<8x1024xf32> to vector<8x1024xbf16>
    %c0_69 = arith.constant 0 : index
    %c0_70 = arith.constant 0 : index
    %211 = vector.load %arg12[%c0_69, %c0_70] : memref<1024x256xbf16, #tpu.memory_space<vmem>>, vector<1024x256xbf16>
    %cst_71 = arith.constant dense<0.000000e+00> : vector<8x256xf32>
    %212 = tpu.matmul %210, %211, %cst_71 {dimension_numbers = #tpu.dot_dimension_numbers<[1], [0], [0], [1], [0, 0, 1, 1], [], []>} : vector<8x1024xbf16>, vector<1024x256xbf16>, vector<8x256xf32> -> vector<8x256xf32>
    %c0_72 = arith.constant 0 : index
    %c0_73 = arith.constant 0 : index
    %213 = vector.load %arg13[%c0_72, %c0_73] : memref<1x256xf32, #tpu.memory_space<vmem>>, vector<1x256xf32>
    %214 = vector.broadcast %213 : vector<1x256xf32> to vector<8x256xf32>
    %215 = arith.addf %212, %214 : vector<8x256xf32>
    %cst_74 = arith.constant 0.000000e+00 : f32
    %216 = vector.broadcast %cst_74 : f32 to vector<8x256xf32>
    %217 = arith.maximumf %215, %216 : vector<8x256xf32>
    %218 = arith.truncf %217 : vector<8x256xf32> to vector<8x256xbf16>
    %c0_75 = arith.constant 0 : index
    %c0_76 = arith.constant 0 : index
    %219 = vector.load %arg14[%c0_75, %c0_76] : memref<256x64xbf16, #tpu.memory_space<vmem>>, vector<256x64xbf16>
    %cst_77 = arith.constant dense<0.000000e+00> : vector<8x64xf32>
    %220 = tpu.matmul %218, %219, %cst_77 {dimension_numbers = #tpu.dot_dimension_numbers<[1], [0], [0], [1], [0, 0, 1, 1], [], []>} : vector<8x256xbf16>, vector<256x64xbf16>, vector<8x64xf32> -> vector<8x64xf32>
    %c0_78 = arith.constant 0 : index
    %c0_79 = arith.constant 0 : index
    %221 = vector.load %arg15[%c0_78, %c0_79] : memref<1x64xf32, #tpu.memory_space<vmem>>, vector<1x64xf32>
    %222 = vector.broadcast %221 : vector<1x64xf32> to vector<8x64xf32>
    %223 = arith.addf %220, %222 : vector<8x64xf32>
    %cst_80 = arith.constant 0.000000e+00 : f32
    %224 = vector.broadcast %cst_80 : f32 to vector<8x64xf32>
    %225 = arith.maximumf %223, %224 : vector<8x64xf32>
    %c0_81 = arith.constant 0 : index
    %c0_82 = arith.constant 0 : index
    %226 = vector.load %arg16[%c0_81, %c0_82] : memref<1x64xbf16, #tpu.memory_space<vmem>>, vector<1x64xbf16>
    %227 = arith.truncf %225 : vector<8x64xf32> to vector<8x64xbf16>
    "tpu.trace_start"() <{level = 10 : i32, message = "ok,sk->os"}> : () -> ()
    %cst_83 = arith.constant dense<0.000000e+00> : vector<1x8xf32>
    %228 = tpu.matmul %226, %227, %cst_83 {dimension_numbers = #tpu.dot_dimension_numbers<[1], [1], [0], [0], [0, 0, 1, 0], [], []>} : vector<1x64xbf16>, vector<8x64xbf16>, vector<1x8xf32> -> vector<1x8xf32>
    "tpu.trace_stop"() : () -> ()
    %c0_84 = arith.constant 0 : index
    %c0_85 = arith.constant 0 : index
    %229 = vector.load %arg17[%c0_84, %c0_85] : memref<1x1xf32, #tpu.memory_space<vmem>>, vector<1x1xf32>
    %230 = vector.broadcast %229 : vector<1x1xf32> to vector<1x8xf32>
    %231 = arith.addf %228, %230 : vector<1x8xf32>
    %232 = arith.negf %231 : vector<1x8xf32>
    %233 = math.exp %232 : vector<1x8xf32>
    %cst_86 = arith.constant 1.000000e+00 : f32
    %234 = vector.broadcast %cst_86 : f32 to vector<1x8xf32>
    %235 = arith.addf %234, %233 : vector<1x8xf32>
    %236 = arith.divf %234, %235 : vector<1x8xf32>
    %cst_87 = arith.constant 0.000000e+00 : f32
    %237 = vector.broadcast %cst_87 : f32 to vector<1x120xf32>
    %238 = tpu.concatenate %236, %237 in 1 : vector<1x8xf32>, vector<1x120xf32> -> vector<1x128xf32>
    %c0_88 = arith.constant 0 : index
    %c0_89 = arith.constant 0 : index
    %239 = vector.load %arg18[%c0_88, %c0_89] : memref<1x128xf32, #tpu.memory_space<vmem>>, vector<1x128xf32>
    tpu.vector_store %arg18[%c0_88, %c0_89], %238 {strides = array<i32>} : memref<1x128xf32, #tpu.memory_space<vmem>>, vector<1x128xf32>,
    return
  }
}

</mosaic_0001>

<bundles_post_ra>
// kernel: tpu_custom_call.1
= control target key start
LH: loop header
LB: loop body
LE: loop exit
PB: predicated region body
PF: predicated region fallthrough
CT: control target
= control target key end

     0   :  { %s3746_s0 = inlined_call_operand.vmem [shape: f32[16,16], index: 0, kind: input, shape index: {}]   ;;  %s3747_s1 = inlined_call_operand.vmem [shape: s8[16,16], index: 1, kind: input, shape index: {}]   ;;  %s3748_s2 = inlined_call_operand.vmem [shape: s32[8,2], index: 2, kind: input, shape index: {}]   ;;  %s3749_s3 = inlined_call_operand.vmem [shape: bf16[16,48], index: 3, kind: input, shape index: {}]   ;;  %s3750_s4 = inlined_call_operand.vmem [shape: bf16[48,6], index: 4, kind: input, shape index: {}]   ;;  %s3751_s5 = inlined_call_operand.vmem [shape: f32[1,16], index: 5, kind: input, shape index: {}]   ;;  %s3752_s6 = inlined_call_operand.vmem [shape: bf16[16,48], index: 6, kind: input, shape index: {}]   ;;  %s3753_s7 = inlined_call_operand.vmem [shape: bf16[48,6], index: 7, kind: input, shape index: {}]   ;;  %s3754_s8 = inlined_call_operand.vmem [shape: f32[1,16], index: 8, kind: input, shape index: {}]   ;;  %s3755_s9 = inlined_call_operand.vmem [shape: bf16[16,1024], index: 9, kind: input, shape index: {}]   ;;  %s3756_s10 = inlined_call_operand.vmem [shape: bf16[16,1024], index: 10, kind: input, shape index: {}]   ;;  %s3757_s11 = inlined_call_operand.vmem [shape: f32[1,1024], index: 11, kind: input, shape index: {}]   ;;  %s3758_s12 = inlined_call_operand.hbm [shape: bf16[1024,256], index: 12, kind: input, shape index: {}]   ;;  %s3759_s13 = inlined_call_operand.vmem [shape: f32[1,256], index: 13, kind: input, shape index: {}]   ;;  %s3760_s14 = inlined_call_operand.vmem [shape: bf16[256,64], index: 14, kind: input, shape index: {}]   ;;  %s3761_s15 = inlined_call_operand.vmem [shape: f32[1,64], index: 15, kind: input, shape index: {}]   ;;  %s3762_s16 = inlined_call_operand.vmem [shape: bf16[1,64], index: 16, kind: input, shape index: {}]   ;;  %s3763_s17 = inlined_call_operand.<no memory space> [shape: f32[1,1], index: 17, kind: input, shape index: {}]   ;;  %s3764_s18 = inlined_call_operand.hbm [shape: f32[1,128], index: 18, kind: output, shape index: {}]  }
   0x1   :  { %3766 = sst [smem:[#allocation9_spill]] %s3746_s0  ;;  %v23_v0 = vstv %s3763_s17 }
   0x2   :  { %3767 = sst [smem:[#allocation10_spill]] %s3747_s1  ;;  %24 = vst [vmem:[#allocation2] sm:$0x1] %v23_v0 }
   0x3   :  { %3768 = sst [smem:[#allocation11_spill]] %s3748_s2 }
   0x4   :  { %25 = vsyncpa [#allocation4], 0 }
   0x5   :  { %26 = vsyncpa [#allocation5], 0  ;;  %s3277_s29 = smov [#allocation3]   ;;  %s3229_s1 = scalar_lea.hbm %s3758_s12, 16384 }
   0x6   :  { %s56_s30 = sshll.u32 %s3277_s29, 4  ;;  %p3230_p0 = scmp.ne.s32.totalorder %s3758_s12, %s3229_s1  ;;  %s57_s30 = int_to_ptr.vmem [resolvable:$true] %s56_s30 }
   0x7   :  { %p3233_p1 = scmp.lt.u32.totalorder %s3229_s1, %s3758_s12 }
   0x9   :  { %p3235_p2 = pnand %p3233_p1, %p3230_p0 }
   0xb   :  { %3238 = shalt.err (!%p3235_p2)
}
   0xc   :  { %s3239_s17 = scalar_lea.vmem %s57_s30, 16384  ;;  %p3244_p4 = scmp.lt.s32.totalorder %s57_s30, %s57_s30 }
   0xd   :  { %p3240_p3 = scmp.ne.s32.totalorder %s57_s30, %s3239_s17  ;;  %p3245_p5 = scmp.lt.s32.totalorder %s3239_s17, %s3239_s17 }
   0xf   :  { %p3246_p6 = por %p3245_p5, %p3244_p4 }
  0x11   :  { %p3247_p7 = pnand %p3246_p6, %p3240_p3 }
  0x13   :  { %3250 = shalt.err (!%p3247_p7)
}
  0x14   :  { %s3278_s23 = smov 128   ;;  %s3279_s24 = smov 8  }
  0x15   :  { %62 = dma.hbm_to_vmem [thread:$0]  %s3758_s12, 16384, %s57_s30, [#allocation4], %s3278_s23, %s3278_s23, %s3279_s24  }
  0x16   :  { %3273 = dma.done.wait [#allocation4], 16384  }
  0x17   :  { %3274 = vsyncadd [#allocation4], 4294950912  ;;  %v3280_v1 = vmov 0.0   ;;  %vm3281_vm0 = vmmov 0   ;;  %v2961_v2 = vld [vmem:[%s3749_s3] sm:$0xff]   ;;  %s3769_s30 = sld [smem:[#allocation9_spill]]  ;;  %v253_v21 = vlaneseq }
  0x18   :  { %2841 = vmatprep.subr.bf16.mxu0 %v3280_v1  ;;  %2843 = vmatprep.mubr.msk.bf16.mxu0 %vm3281_vm0, %v3280_v1  ;;  %vm96_vm1 = vcmask 130048   ;;  %v2962_v6 = vld [vmem:[%s3750_s4] sm:$0xff]   ;;  %v2963_v7 = vld [vmem:[%s3750_s4 + $0x8] sm:$0xff]   ;;  %v2964_v8 = vld [vmem:[%s3750_s4 + $0x10] sm:$0xff]   ;;  %v3282_v9 = vmov 5   ;;  %v3283_v10 = vmov 4  }
  0x19   :  { %2847 = vmatprep.subr.bf16.mxu1 %v3280_v1  ;;  %2853 = vmatprep.mubr.msk.bf16.mxu1 %vm3281_vm0, %v3280_v1  ;;  %vm166_vm2 = vcmask 392192   ;;  %v3284_v20 = vmov 3   ;;  %v3444_v24 = vshrl.u32 %v253_v21, 7  ;;  %s3770_s23 = sld [smem:[#allocation10_spill]]  ;;  %s3285_s24 = smov 112   ;;  %vm395_vm11 = vcmask 261120  }
  0x1a   :  { %2842 = vmatpush3.bf16.msra.mxu0 %v2961_v2  ;;  %2848 = vmatpush3.bf16.msra.mxu1 %v2962_v6  ;;  %s3286_s25 = smov 16   ;;  %s3287_s26 = smov 32  }
  0x1b   :  { %2893 = vmatprep.subr.bf16.mxu0 %v3280_v1  ;;  %2849 = vmatprep.subr.bf16.mxu1 %v3280_v1  ;;  %v3450_v29 = vsub.s32 1, %v3444_v24  ;;  %v3453_v30 = vsub.s32 2, %v3444_v24  ;;  %v3456_v32 = vsub.s32 0, %v3444_v24  ;;  %s3288_s27 = smov 96   ;;  %s3771_s22 = sld [smem:[#allocation11_spill]] }
  0x1c   :  { %2933 = vset.pattern.permute.xlu1 %v3282_v9  ;;  %2932 = vset.pattern.permute.xlu0 %v3283_v10  ;;  %s3290_s3 = smov 127  }
  0x1d   :  { %v85_v3 = vld [vmem:[%s3769_s30] sm:$0xff]  ;;  %v86_v4 = vld [vmem:[%s3769_s30 + $0x8] sm:$0xff] }
  0x1e   :  { %v87_v5 = vpack.c.bf16 %v86_v4, %v85_v3  ;;  %2850 = vmatpush3.bf16.msra.mxu1 %v2963_v7 }
  0x1f   :  { %2851 = vmatprep.subr.bf16.mxu1 %v3280_v1  ;;  %v2792_v25 = vld [vmem:[%s3770_s23] sm:$0xf]  }
  0x20   :  { %2844 = vmatmul.mubr.msk.bf16.vlgmr.msra.gmra.mrb[0].mxu0 %vm96_vm1, %v87_v5  ;;  %v2794_v27 = vunpack.c.1.s8 %v2792_v25  ;;  %v2793_v28 = vunpack.c.0.s8 %v2792_v25 }
  0x21   :  { %2895 = vmatprep.mubr.msk.bf16.mxu0 %vm3281_vm0, %v3280_v1 }
  0x22   :  { %2852 = vmatpush3.bf16.msra.mxu1 %v2964_v8  ;;  %v3458_v34 = vcvt.s32.f32 %v2794_v27  ;;  %v3460_v35 = vcvt.s32.f32 %v2793_v28 }
  0x23   :  { %2857 = vmatprep.subr.bf16.mxu1 %v3280_v1 }
  0x24   :  { %vm84_vm3 = vcmp.gt.f32.partialorder %v3458_v34, 0.0  ;;  %vm83_vm4 = vcmp.gt.f32.partialorder %v3460_v35, 0.0 }
  0xf3   :  { %v134_v11 = vpop.f32.mrb[0].mxu0 }
  0xf4   :  { %v2845_v12 = vpop.f32.mrb[1].mxu0 }
  0xf5   :  { %v137_v13 = vpop.f32.mrb[2].mxu0 }
  0xf6   :  { %v3434_v14 = vpack.c.bf16 %v137_v13, %v134_v11  ;;  %v2846_v15 = vpop.f32.mrb[3].mxu0 }
  0xf8   :  { %2854 = vmatmul.mubr.msk.bf16.vlgmr.msra.gmra.mrb[0].mxu1 %vm166_vm2, %v3434_v14 }
  0xf9   :  { %2858 = vmatpush3.bf16.msra.mxu1 %v3434_v14  ;;  %2863 = vmatprep.mubr.msk.bf16.mxu1 %vm3281_vm0, %v3280_v1 }
  0xfa   :  { %2859 = vmatprep.subr.bf16.mxu1 %v3280_v1 }
 0x1cb   :  { %v204_v16 = vpop.f32.mrb[0].mxu1 }
 0x1cc   :  { %334 = vperm.xlu1 %2933, %v204_v16   ;;  %290 = vperm.xlu0 %2932, %v204_v16   ;;  %v2855_v17 = vpop.f32.mrb[1].mxu1 }
 0x1cd   :  { %v207_v18 = vpop.f32.mrb[2].mxu1 }
 0x1ce   :  { %v2856_v19 = vpop.f32.mrb[3].mxu1 }
 0x1d0   :  { %338 = vperm.xlu1 %2933, %v207_v18   ;;  %294 = vperm.xlu0 %2932, %v207_v18  }
 0x1d4   :  { %2934 = vset.pattern.permute.xlu1 %v3284_v20 }
 0x1d5   :  { %245 = vperm.xlu1 %2934, %v204_v16  }
 0x1d9   :  { %250 = vperm.xlu1 %2934, %v207_v18  }
 0x1dd   :  { %2946 = vset.pattern.permute.xlu1 %v3283_v10 }
 0x1ee   :  { %211 = vxpose.xlu0.b32.start [1/2] (short) (narrow) %v204_v16, 8 }
 0x1f2   :  { %212 = vxpose.xlu0.b32.end [2/2] (short) (narrow) %v207_v18, 8 }
 0x24b   :  { %v291_v22 = vpop.permute.xlu0 %290  ;;  %v335_v23 = vpop.permute.xlu1 %334 }
 0x24f   :  { %v295_v26 = vpop.permute.xlu0 %294  ;;  %v339_v31 = vpop.permute.xlu1 %338 }
 0x254   :  { %v246_v41 = vpop.permute.xlu1 %245 }
 0x258   :  { %v251_v56 = vpop.permute.xlu1 %250 }
 0x26e   :  { %v227_v33 = vpop.trf.xlu0 }
 0x26f   :  { %v300_v36 = vrot.slane %v227_v33, %v3450_v29  ;;  %v344_v37 = vrot.slane %v227_v33, %v3453_v30  ;;  %v256_v38 = vrot.slane %v227_v33, %v3456_v32 }
 0x271   :  { %v301_v39 = vadd.f32 %v300_v36, %v291_v22  ;;  %v302_v40 = vadd.f32 %v300_v36, %v295_v26  ;;  %v345_v42 = vadd.f32 %v344_v37, %v335_v23  ;;  %v346_v43 = vadd.f32 %v344_v37, %v339_v31 }
 0x272   :  { %v257_v47 = vadd.f32 %v256_v38, %v246_v41  ;;  %v258_v58 = vadd.f32 %v256_v38, %v251_v56 }
 0x273   :  { %vm304_vm5 = vcmp.ge.f32.partialorder %v302_v40, 0.0  ;;  %v306_v44 = vmul.f32 0.2, %v302_v40  ;;  %vm303_vm6 = vcmp.ge.f32.partialorder %v301_v39, 0.0  ;;  %v305_v45 = vmul.f32 0.2, %v301_v39 }
 0x274   :  { %vm347_vm7 = vcmp.ge.f32.partialorder %v345_v42, 0.0  ;;  %v349_v46 = vmul.f32 0.2, %v345_v42  ;;  %v350_v50 = vmul.f32 0.2, %v346_v43  ;;  %vm348_vm8 = vcmp.ge.f32.partialorder %v346_v43, 0.0 }
 0x275   :  { %v308_v48 = vsel %vm304_vm5, %v302_v40, %v306_v44  ;;  %v307_v49 = vsel %vm303_vm6, %v301_v39, %v305_v45  ;;  %v261_v60 = vmul.f32 0.2, %v257_v47  ;;  %vm259_vm9 = vcmp.ge.f32.partialorder %v257_v47, 0.0 }
 0x276   :  { %v310_v51 = vsel %vm84_vm3, %v308_v48, -1e+30  ;;  %v309_v52 = vsel %vm83_vm4, %v307_v49, -1e+30  ;;  %v351_v53 = vsel %vm347_vm7, %v345_v42, %v349_v46  ;;  %v352_v59 = vsel %vm348_vm8, %v346_v43, %v350_v50 }
 0x277   :  { %v314_v54 = vsel %vm96_vm1, %v310_v51, -inf  ;;  %v311_v55 = vsel %vm96_vm1, %v309_v52, -inf  ;;  %v353_v57 = vsel %vm83_vm4, %v351_v53, -1e+30  ;;  %v354_v62 = vsel %vm84_vm3, %v352_v59, -1e+30 }
 0x278   :  { %315 = vmax.xlane.f32.xlu0 %v314_v54  ;;  %312 = vmax.xlane.f32.xlu1 %v311_v55  ;;  %v355_v61 = vsel %vm96_vm1, %v353_v57, -inf  ;;  %v263_v63 = vsel %vm259_vm9, %v257_v47, %v261_v60  ;;  %v262_v0 = vmul.f32 0.2, %v258_v58  ;;  %vm260_vm10 = vcmp.ge.f32.partialorder %v258_v58, 0.0 }
 0x279   :  { %v358_v2 = vsel %vm96_vm1, %v354_v62, -inf  ;;  %v265_v3 = vsel %vm83_vm4, %v263_v63, -1e+30 }
 0x27a   :  { %v264_v4 = vsel %vm260_vm10, %v258_v58, %v262_v0  ;;  %v267_v5 = vsel %vm96_vm1, %v265_v3, -inf }
 0x27b   :  { %v266_v6 = vsel %vm84_vm3, %v264_v4, -1e+30 }
 0x27c   :  { %356 = vmax.xlane.f32.xlu1 %v355_v61  ;;  %v270_v7 = vsel %vm96_vm1, %v266_v6, -inf }
 0x280   :  { %359 = vmax.xlane.f32.xlu1 %v358_v2 }
 0x284   :  { %268 = vmax.xlane.f32.xlu1 %v267_v5 }
 0x288   :  { %271 = vmax.xlane.f32.xlu1 %v270_v7 }
 0x305   :  { %v313_v8 = vpop.xlane.xlu1 %312  ;;  %v316_v10 = vpop.xlane.xlu0 %315 }
 0x306   :  { %v317_v11 = vsub.f32 %v309_v52, %v313_v8  ;;  %v318_v13 = vsub.f32 %v310_v51, %v316_v10 }
 0x308   :  { %v319_v12 = vmul.f32 1.442695, %v317_v11  ;;  %v321_v18 = vmul.f32 1.442695, %v318_v13 }
 0x309   :  { %v357_v15 = vpop.xlane.xlu1 %356 }
 0x30a   :  { %v361_v16 = vsub.f32 %v353_v57, %v357_v15  ;;  %3177 = vpow2.f32 %v319_v12 }
 0x30c   :  { %v363_v17 = vmul.f32 1.442695, %v361_v16 }
 0x30d   :  { %v360_v19 = vpop.xlane.xlu1 %359 }
 0x30e   :  { %3179 = vpow2.f32 %v363_v17  ;;  %v362_v22 = vsub.f32 %v354_v62, %v360_v19  ;;  %v2965_v19 = vld [vmem:[%s3752_s6] sm:$0xff]  }
 0x30f   :  { %3181 = vpow2.f32 %v321_v18 }
 0x310   :  { %v365_v23 = vmul.f32 1.442695, %v362_v22 }
 0x311   :  { %v269_v25 = vpop.xlane.xlu1 %268 }
 0x312   :  { %v273_v26 = vsub.f32 %v265_v3, %v269_v25  ;;  %3183 = vpow2.f32 %v365_v23  ;;  %v2610_v23 = vld [vmem:[%s3751_s5] ss:$0 sm:$0xff] }
 0x314   :  { %v3178_v27 = vpop.eup %3177  ;;  %v275_v28 = vmul.f32 1.442695, %v273_v26 }
 0x315   :  { %v272_v31 = vpop.xlane.xlu1 %271  ;;  %v323_v36 = vsel %vm96_vm1, %v3178_v27, 0.0 }
 0x316   :  { %v274_v33 = vsub.f32 %v266_v6, %v272_v31  ;;  %324 = vadd.xlane.f32.xlu1 %v323_v36  ;;  %3185 = vpow2.f32 %v275_v28 }
 0x318   :  { %v3180_v37 = vpop.eup %3179  ;;  %v277_v38 = vmul.f32 1.442695, %v274_v33 }
 0x319   :  { %v367_v39 = vsel %vm96_vm1, %v3180_v37, 0.0  ;;  %v3182_v40 = vpop.eup %3181 }
 0x31a   :  { %3187 = vpow2.f32 %v277_v38  ;;  %368 = vadd.xlane.f32.xlu1 %v367_v39  ;;  %v326_v41 = vsel %vm96_vm1, %v3182_v40, 0.0  ;;  %v2966_v39 = vld [vmem:[%s3753_s7] sm:$0xff]  }
 0x31c   :  { %v3184_v42 = vpop.eup %3183 }
 0x31d   :  { %v370_v43 = vsel %vm96_vm1, %v3184_v42, 0.0 }
 0x31e   :  { %327 = vadd.xlane.f32.xlu1 %v326_v41  ;;  %v2967_v41 = vld [vmem:[%s3753_s7 + $0x8] sm:$0xff]  }
 0x320   :  { %v3186_v44 = vpop.eup %3185 }
 0x321   :  { %v279_v47 = vsel %vm96_vm1, %v3186_v44, 0.0 }
 0x322   :  { %371 = vadd.xlane.f32.xlu1 %v370_v43 }
 0x324   :  { %v3188_v45 = vpop.eup %3187 }
 0x325   :  { %v282_v46 = vsel %vm96_vm1, %v3188_v45, 0.0 }
 0x326   :  { %283 = vadd.xlane.f32.xlu0 %v282_v46  ;;  %280 = vadd.xlane.f32.xlu1 %v279_v47 }
 0x337   :  { %400 = vrot.lane.b32.xlu1 %v3434_v14, %s3285_s24 }
 0x3a3   :  { %v325_v48 = vpop.xlane.xlu1 %324 }
 0x3a4   :  { %3189 = vrcp.f32 %v325_v48 }
 0x3a7   :  { %v369_v49 = vpop.xlane.xlu1 %368 }
 0x3ab   :  { %v328_v50 = vpop.xlane.xlu1 %327 }
 0x3ac   :  { %3191 = vrcp.f32 %v328_v50 }
 0x3ad   :  { %3193 = vrcp.f32 %v369_v49 }
 0x3ae   :  { %v3190_v53 = vpop.eup %3189 }
 0x3af   :  { %v372_v51 = vpop.xlane.xlu1 %371  ;;  %v331_v56 = vmul.f32 %v3190_v53, %v3178_v27 }
 0x3b0   :  { %3195 = vrcp.f32 %v372_v51 }
 0x3b3   :  { %v281_v52 = vpop.xlane.xlu1 %280  ;;  %v284_v0 = vpop.xlane.xlu0 %283 }
 0x3b4   :  { %3197 = vrcp.f32 %v284_v0 }
 0x3b5   :  { %3199 = vrcp.f32 %v281_v52 }
 0x3b6   :  { %v3192_v54 = vpop.eup %3191 }
 0x3b7   :  { %v401_v55 = vpop.permute.xlu1 %400  ;;  %v332_v57 = vmul.f32 %v3192_v54, %v3182_v40  ;;  %v3194_v58 = vpop.eup %3193 }
 0x3b8   :  { %2860 = vmatpush3.bf16.msra.mxu1 %v401_v55  ;;  %v375_v61 = vmul.f32 %v3194_v58, %v3180_v37 }
 0x3b9   :  { %v2935_v59 = vpack.i.bf16 %v332_v57, %v331_v56  ;;  %2861 = vmatprep.subr.bf16.mxu1 %v3280_v1 }
 0x3ba   :  { %v3196_v60 = vpop.eup %3195 }
 0x3bb   :  { %2936 = vrot.lane.b32.xlu0 %v2935_v59, %s3286_s25  ;;  %v376_v62 = vmul.f32 %v3196_v60, %v3184_v42  ;;  %v2968_v42 = vld [vmem:[%s3753_s7 + $0x10] sm:$0xff]  }
 0x3bd   :  { %v2940_v63 = vpack.i.bf16 %v376_v62, %v375_v61 }
 0x3be   :  { %v3198_v2 = vpop.eup %3197 }
 0x3bf   :  { %2941 = vrot.lane.b32.xlu1 %v2940_v63, %s3287_s26  ;;  %v3200_v4 = vpop.eup %3199  ;;  %v288_v7 = vmul.f32 %v3198_v2, %v3188_v45 }
 0x3c0   :  { %v287_v8 = vmul.f32 %v3200_v4, %v3186_v44 }
 0x3c3   :  { %403 = vrot.lane.b32.xlu1 %v3434_v14, %s3288_s27 }
 0x42d   :  { %v2937_v3 = vpop.permute.xlu0 %2936 }
 0x42e   :  { %v2939_v5 = vunpack.i.h.bf16 %v2937_v3  ;;  %v2938_v6 = vunpack.i.l.bf16 %v2937_v3 }
 0x430   :  { %v394_v13 = vsel %vm96_vm1, %v288_v7, %v2939_v5  ;;  %v393_v15 = vsel %vm96_vm1, %v287_v8, %v2938_v6 }
 0x431   :  { %v2942_v10 = vpop.permute.xlu1 %2941 }
 0x432   :  { %v2944_v11 = vunpack.i.h.bf16 %v2942_v10  ;;  %v2943_v12 = vunpack.i.l.bf16 %v2942_v10 }
 0x434   :  { %v397_v14 = vsel %vm395_vm11, %v394_v13, %v2944_v11  ;;  %v396_v16 = vsel %vm395_vm11, %v393_v15, %v2943_v12 }
 0x435   :  { %v404_v17 = vpop.permute.xlu1 %403  ;;  %v398_v18 = vpack.c.bf16 %v397_v14, %v396_v16 }
 0x436   :  { %2862 = vmatpush3.bf16.msra.mxu1 %v404_v17 }
 0x437   :  { %2867 = vmatprep.subr.bf16.mxu1 %v3280_v1 }
 0x439   :  { %2864 = vmatmul.mubr.msk.bf16.vlgmr.msra.gmra.mrb[4].mxu1 %vm166_vm2, %v398_v18 }
 0x43a   :  { %2869 = vmatprep.mubr.msk.bf16.mxu1 %vm3281_vm0, %v3280_v1  ;;  %2868 = vmatpush3.bf16.msra.mxu1 %v2965_v19 }
 0x43b   :  { %2873 = vmatprep.subr.bf16.mxu1 %v3280_v1 }
 0x50c   :  { %v443_v22 = vpop.f32.mrb[4].mxu1 }
 0x50d   :  { %v450_v25 = vmul.f32 0.33333334, %v443_v22  ;;  %v2865_v26 = vpop.f32.mrb[5].mxu1 }
 0x50e   :  { %v446_v27 = vpop.f32.mrb[6].mxu1 }
 0x50f   :  { %v459_v28 = vadd.f32 %v2610_v23, %v450_v25  ;;  %v451_v31 = vmul.f32 0.33333334, %v446_v27  ;;  %v2866_v33 = vpop.f32.mrb[7].mxu1 }
 0x511   :  { %v460_v36 = vadd.f32 %v2610_v23, %v451_v31  ;;  %v461_v37 = vmax.f32 %v459_v28, 0.0 }
 0x513   :  { %v462_v38 = vmax.f32 %v460_v36, 0.0 }
 0x515   :  { %v463_v40 = vpack.c.bf16 %v462_v38, %v461_v37 }
 0x517   :  { %2870 = vmatmul.mubr.msk.bf16.vlgmr.msra.gmra.mrb[8].mxu1 %vm96_vm1, %v463_v40 }
 0x518   :  { %2874 = vmatpush3.bf16.msra.mxu1 %v2966_v39  ;;  %2879 = vmatprep.mubr.msk.bf16.mxu1 %vm3281_vm0, %v3280_v1 }
 0x519   :  { %2875 = vmatprep.subr.bf16.mxu1 %v3280_v1 }
 0x51c   :  { %2876 = vmatpush3.bf16.msra.mxu1 %v2967_v41 }
 0x51d   :  { %2877 = vmatprep.subr.bf16.mxu1 %v3280_v1 }
 0x520   :  { %2878 = vmatpush3.bf16.msra.mxu1 %v2968_v42 }
 0x521   :  { %2883 = vmatprep.subr.bf16.mxu1 %v3280_v1 }
 0x5ea   :  { %v509_v43 = vpop.f32.mrb[8].mxu1 }
 0x5eb   :  { %v2871_v44 = vpop.f32.mrb[9].mxu1 }
 0x5ec   :  { %v512_v45 = vpop.f32.mrb[10].mxu1 }
 0x5ed   :  { %v3528_v46 = vpack.c.bf16 %v512_v45, %v509_v43  ;;  %v2872_v47 = vpop.f32.mrb[11].mxu1 }
 0x5ef   :  { %2880 = vmatmul.mubr.msk.bf16.vlgmr.msra.gmra.mrb[12].mxu1 %vm166_vm2, %v3528_v46 }
 0x5f0   :  { %2884 = vmatpush3.bf16.msra.mxu1 %v3528_v46  ;;  %2889 = vmatprep.mubr.msk.bf16.mxu1 %vm3281_vm0, %v3280_v1 }
 0x5f1   :  { %2885 = vmatprep.subr.bf16.mxu1 %v3280_v1 }
 0x6c2   :  { %v578_v48 = vpop.f32.mrb[12].mxu1 }
 0x6c3   :  { %664 = vperm.xlu0 %2932, %v578_v48   ;;  %v2881_v49 = vpop.f32.mrb[13].mxu1 }
 0x6c4   :  { %v581_v50 = vpop.f32.mrb[14].mxu1 }
 0x6c5   :  { %668 = vperm.xlu1 %2946, %v581_v50   ;;  %v2882_v51 = vpop.f32.mrb[15].mxu1 }
 0x6c7   :  { %2945 = vset.pattern.permute.xlu0 %v3282_v9 }
 0x6c8   :  { %708 = vperm.xlu0 %2945, %v578_v48  }
 0x6c9   :  { %2947 = vset.pattern.permute.xlu1 %v3282_v9 }
 0x6ca   :  { %712 = vperm.xlu1 %2947, %v581_v50  }
 0x6cc   :  { %2948 = vset.pattern.permute.xlu0 %v3284_v20 }
 0x6cd   :  { %619 = vperm.xlu0 %2948, %v578_v48  }
 0x6d1   :  { %624 = vperm.xlu0 %2948, %v581_v50  }
 0x6f3   :  { %585 = vxpose.xlu1.b32.start [1/2] (short) (narrow) %v578_v48, 8 }
 0x6f7   :  { %586 = vxpose.xlu1.b32.end [2/2] (short) (narrow) %v581_v50, 8 }
 0x742   :  { %v665_v53 = vpop.permute.xlu0 %664 }
 0x744   :  { %v669_v52 = vpop.permute.xlu1 %668 }
 0x747   :  { %v709_v55 = vpop.permute.xlu0 %708 }
 0x749   :  { %v713_v54 = vpop.permute.xlu1 %712 }
 0x74c   :  { %v620_v61 = vpop.permute.xlu0 %619 }
 0x750   :  { %v625_v13 = vpop.permute.xlu0 %624 }
 0x773   :  { %v601_v56 = vpop.trf.xlu1 }
 0x774   :  { %v674_v57 = vrot.slane %v601_v56, %v3450_v29  ;;  %v718_v58 = vrot.slane %v601_v56, %v3453_v30  ;;  %v630_v59 = vrot.slane %v601_v56, %v3456_v32 }
 0x776   :  { %v675_v60 = vadd.f32 %v674_v57, %v665_v53  ;;  %v676_v9 = vadd.f32 %v674_v57, %v669_v52  ;;  %v719_v62 = vadd.f32 %v718_v58, %v709_v55  ;;  %v720_v20 = vadd.f32 %v718_v58, %v713_v54 }
 0x777   :  { %v631_v3 = vadd.f32 %v630_v59, %v620_v61  ;;  %v632_v14 = vadd.f32 %v630_v59, %v625_v13 }
 0x778   :  { %vm678_vm12 = vcmp.ge.f32.partialorder %v676_v9, 0.0  ;;  %v680_v63 = vmul.f32 0.2, %v676_v9  ;;  %vm677_vm13 = vcmp.ge.f32.partialorder %v675_v60, 0.0  ;;  %v679_v0 = vmul.f32 0.2, %v675_v60 }
 0x779   :  { %vm721_vm14 = vcmp.ge.f32.partialorder %v719_v62, 0.0  ;;  %v723_v2 = vmul.f32 0.2, %v719_v62  ;;  %v724_v6 = vmul.f32 0.2, %v720_v20  ;;  %vm722_vm15 = vcmp.ge.f32.partialorder %v720_v20, 0.0 }
 0x77a   :  { %v682_v4 = vsel %vm678_vm12, %v676_v9, %v680_v63  ;;  %v681_v5 = vsel %vm677_vm13, %v675_v60, %v679_v0  ;;  %v635_v17 = vmul.f32 0.2, %v631_v3  ;;  %vm633_vm5 = vcmp.ge.f32.partialorder %v631_v3, 0.0 }
 0x77b   :  { %v684_v7 = vsel %vm84_vm3, %v682_v4, -1e+30  ;;  %v683_v8 = vsel %vm83_vm4, %v681_v5, -1e+30  ;;  %v725_v10 = vsel %vm721_vm14, %v719_v62, %v723_v2  ;;  %v726_v16 = vsel %vm722_vm15, %v720_v20, %v724_v6 }
 0x77c   :  { %v688_v11 = vsel %vm96_vm1, %v684_v7, -inf  ;;  %v685_v12 = vsel %vm96_vm1, %v683_v8, -inf  ;;  %v727_v15 = vsel %vm83_vm4, %v725_v10, -1e+30  ;;  %v728_v19 = vsel %vm84_vm3, %v726_v16, -1e+30 }
 0x77d   :  { %689 = vmax.xlane.f32.xlu1 %v688_v11  ;;  %686 = vmax.xlane.f32.xlu0 %v685_v12  ;;  %v729_v18 = vsel %vm96_vm1, %v727_v15, -inf  ;;  %v637_v22 = vsel %vm633_vm5, %v631_v3, %v635_v17  ;;  %v636_v23 = vmul.f32 0.2, %v632_v14  ;;  %vm634_vm6 = vcmp.ge.f32.partialorder %v632_v14, 0.0  ;;  %v836_v11 = vld [vmem:[%s3771_s22] sm:$0xff] }
 0x77e   :  { %v732_v25 = vsel %vm96_vm1, %v728_v19, -inf  ;;  %v639_v26 = vsel %vm83_vm4, %v637_v22, -1e+30  ;;  %v837_v17 = vadd.s32 8, %v836_v11 }
 0x77f   :  { %v638_v27 = vsel %vm634_vm6, %v632_v14, %v636_v23  ;;  %v641_v28 = vsel %vm96_vm1, %v639_v26, -inf }
 0x780   :  { %v640_v31 = vsel %vm84_vm3, %v638_v27, -1e+30 }
 0x781   :  { %730 = vmax.xlane.f32.xlu0 %v729_v18  ;;  %v644_v33 = vsel %vm96_vm1, %v640_v31, -inf }
 0x785   :  { %733 = vmax.xlane.f32.xlu0 %v732_v25 }
 0x789   :  { %642 = vmax.xlane.f32.xlu0 %v641_v28 }
 0x78d   :  { %645 = vmax.xlane.f32.xlu0 %v644_v33 }
 0x78e   :  { %773 = vrot.lane.b32.xlu1 %v3528_v46, %s3285_s24 }
 0x80a   :  { %v690_v36 = vpop.xlane.xlu1 %689  ;;  %v687_v37 = vpop.xlane.xlu0 %686 }
 0x80b   :  { %v691_v38 = vsub.f32 %v683_v8, %v687_v37  ;;  %v692_v40 = vsub.f32 %v684_v7, %v690_v36 }
 0x80d   :  { %v693_v39 = vmul.f32 1.442695, %v691_v38  ;;  %v695_v43 = vmul.f32 1.442695, %v692_v40 }
 0x80e   :  { %v774_v35 = vpop.permute.xlu1 %773  ;;  %v731_v41 = vpop.xlane.xlu0 %730 }
 0x80f   :  { %v735_v42 = vsub.f32 %v727_v15, %v731_v41  ;;  %2886 = vmatpush3.bf16.msra.mxu1 %v774_v35  ;;  %3201 = vpow2.f32 %v693_v39  ;;  %v3289_v15 = vmov 0  }
 0x810   :  { %2887 = vmatprep.subr.bf16.mxu1 %v3280_v1  ;;  %2960 = vset.pattern.permute.xlu0 %v3289_v15 }
 0x811   :  { %v737_v34 = vmul.f32 1.442695, %v735_v42  ;;  %2959 = vset.pattern.permute.xlu1 %v3289_v15 }
 0x812   :  { %v734_v44 = vpop.xlane.xlu0 %733 }
 0x813   :  { %3203 = vpow2.f32 %v737_v34  ;;  %v736_v45 = vsub.f32 %v728_v19, %v734_v44  ;;  %v2522_v19 = vld [vmem:[#allocation2] sm:$0x1] }
 0x814   :  { %3205 = vpow2.f32 %v695_v43 }
 0x815   :  { %v739_v47 = vmul.f32 1.442695, %v736_v45  ;;  %v2618_v45 = vld [vmem:[%s3754_s8] ss:$0 sm:$0xff] }
 0x816   :  { %v643_v48 = vpop.xlane.xlu0 %642 }
 0x817   :  { %v647_v49 = vsub.f32 %v639_v26, %v643_v48  ;;  %3207 = vpow2.f32 %v739_v47  ;;  %v841_v47 = vand.u32 127, %v253_v21  ;;  %v908_v21 = vld [vmem:[%s3756_s10] sm:$0xff] }
 0x819   :  { %v3202_v50 = vpop.eup %3201  ;;  %v649_v51 = vmul.f32 1.442695, %v647_v49 }
 0x81a   :  { %v646_v52 = vpop.xlane.xlu0 %645  ;;  %v697_v54 = vsel %vm96_vm1, %v3202_v50, 0.0 }
 0x81b   :  { %v648_v53 = vsub.f32 %v640_v31, %v646_v52  ;;  %698 = vadd.xlane.f32.xlu0 %v697_v54  ;;  %3209 = vpow2.f32 %v649_v51 }
 0x81d   :  { %v3204_v55 = vpop.eup %3203  ;;  %v651_v56 = vmul.f32 1.442695, %v648_v53 }
 0x81e   :  { %v741_v57 = vsel %vm96_vm1, %v3204_v55, 0.0  ;;  %v3206_v58 = vpop.eup %3205 }
 0x81f   :  { %742 = vadd.xlane.f32.xlu0 %v741_v57  ;;  %3211 = vpow2.f32 %v651_v56  ;;  %v700_v59 = vsel %vm96_vm1, %v3206_v58, 0.0 }
 0x821   :  { %v3208_v60 = vpop.eup %3207 }
 0x822   :  { %v744_v9 = vsel %vm96_vm1, %v3208_v60, 0.0 }
 0x823   :  { %701 = vadd.xlane.f32.xlu0 %v700_v59 }
 0x825   :  { %v3210_v61 = vpop.eup %3209 }
 0x826   :  { %v653_v62 = vsel %vm96_vm1, %v3210_v61, 0.0 }
 0x827   :  { %745 = vadd.xlane.f32.xlu0 %v744_v9 }
 0x829   :  { %v3212_v20 = vpop.eup %3211 }
 0x82a   :  { %v656_v63 = vsel %vm96_vm1, %v3212_v20, 0.0 }
 0x82b   :  { %654 = vadd.xlane.f32.xlu0 %v653_v62  ;;  %v912_v62 = vld [vmem:[%s3756_s10 + $0x20] sm:$0xff] }
 0x82f   :  { %657 = vadd.xlane.f32.xlu0 %v656_v63  ;;  %v2620_v63 = vcombine.low %v908_v21, %v912_v62 }
 0x8a8   :  { %v699_v0 = vpop.xlane.xlu0 %698 }
 0x8a9   :  { %3213 = vrcp.f32 %v699_v0  ;;  %v2621_v0 = vcombine.high %v908_v21, %v912_v62  ;;  %v3010_v21 = vld [vmem:[#allocation3 + $0x254] ss:$8 sps:$4 sm:$0xff]   ;;  %v2993_v62 = vld [vmem:[#allocation3 + $0x50] ss:$8 sps:$4 sm:$0xff]  }
 0x8ac   :  { %v743_v2 = vpop.xlane.xlu0 %742 }
 0x8b0   :  { %v702_v3 = vpop.xlane.xlu0 %701 }
 0x8b1   :  { %3215 = vrcp.f32 %v702_v3 }
 0x8b2   :  { %3217 = vrcp.f32 %v743_v2  ;;  %v913_v2 = vld [vmem:[%s3756_s10 + $0x28] sm:$0xff] }
 0x8b3   :  { %v3214_v5 = vpop.eup %3213 }
 0x8b4   :  { %v746_v4 = vpop.xlane.xlu0 %745  ;;  %v705_v7 = vmul.f32 %v3214_v5, %v3202_v50  ;;  %v910_v5 = vld [vmem:[%s3756_s10 + $0x10] sm:$0xff] }
 0x8b5   :  { %3219 = vrcp.f32 %v746_v4 }
 0x8b8   :  { %v655_v22 = vpop.xlane.xlu0 %654 }
 0x8b9   :  { %3221 = vrcp.f32 %v655_v22  ;;  %v904_v22 = vld [vmem:[%s3755_s9 + $0x28] sm:$0xff] }
 0x8bb   :  { %v3216_v6 = vpop.eup %3215 }
 0x8bc   :  { %v706_v8 = vmul.f32 %v3216_v6, %v3206_v58  ;;  %v3218_v10 = vpop.eup %3217  ;;  %v658_v23 = vpop.xlane.xlu0 %657  ;;  %v914_v6 = vld [vmem:[%s3756_s10 + $0x30] sm:$0xff] }
 0x8bd   :  { %v749_v14 = vmul.f32 %v3218_v10, %v3204_v55  ;;  %3223 = vrcp.f32 %v658_v23  ;;  %v2625_v10 = vcombine.high %v910_v5, %v914_v6 }
 0x8be   :  { %v2949_v12 = vpack.i.bf16 %v706_v8, %v705_v7  ;;  %v911_v7 = vld [vmem:[%s3756_s10 + $0x18] sm:$0xff]  ;;  %v2624_v8 = vcombine.low %v910_v5, %v914_v6 }
 0x8bf   :  { %v3220_v13 = vpop.eup %3219  ;;  %v3022_v5 = vld [vmem:[#allocation3 + $0x274] ss:$8 sps:$4 sm:$0xff]   ;;  %v3005_v6 = vld [vmem:[#allocation3 + $0x70] ss:$8 sps:$4 sm:$0xff]  }
 0x8c0   :  { %2950 = vrot.lane.b32.xlu0 %v2949_v12, %s3286_s25  ;;  %v750_v16 = vmul.f32 %v3220_v13, %v3208_v60 }
 0x8c2   :  { %v2954_v18 = vpack.i.bf16 %v750_v16, %v749_v14  ;;  %v899_v16 = vld [vmem:[%s3755_s9] sm:$0xff] }
 0x8c3   :  { %v3222_v25 = vpop.eup %3221 }
 0x8c4   :  { %2955 = vrot.lane.b32.xlu1 %v2954_v18, %s3287_s26  ;;  %838 = vrot.lane.b32.xlu0 %v837_v17, %s3290_s3  ;;  %v661_v33 = vmul.f32 %v3222_v25, %v3210_v61  ;;  %v903_v18 = vld [vmem:[%s3755_s9 + $0x20] sm:$0xff] }
 0x8c7   :  { %v3224_v27 = vpop.eup %3223 }
 0x8c8   :  { %776 = vrot.lane.b32.xlu1 %v3528_v46, %s3288_s27  ;;  %v662_v36 = vmul.f32 %v3224_v27, %v3212_v20  ;;  %v909_v20 = vld [vmem:[%s3756_s10 + $0x8] sm:$0xff]  ;;  %v2633_v27 = vcombine.high %v899_v16, %v903_v18 }
 0x8c9   :  { %v2622_v3 = vcombine.low %v909_v20, %v913_v2  ;;  %v2623_v4 = vcombine.high %v909_v20, %v913_v2  ;;  %v3008_v20 = vld [vmem:[#allocation3 + $0x250] ss:$8 sps:$4 sm:$0xff]   ;;  %v2999_v2 = vld [vmem:[#allocation3 + $0x60] ss:$8 sps:$4 sm:$0xff]  }
 0x8cc   :  { %843 = vperm.xlu1 %2959, %v836_v11   ;;  %v915_v11 = vld [vmem:[%s3756_s10 + $0x38] sm:$0xff] }
 0x8cd   :  { %v2626_v12 = vcombine.low %v911_v7, %v915_v11  ;;  %v2627_v13 = vcombine.high %v911_v7, %v915_v11  ;;  %v3020_v7 = vld [vmem:[#allocation3 + $0x270] ss:$8 sps:$4 sm:$0xff]   ;;  %v3019_v11 = vld [vmem:[#allocation3 + $0x94] ss:$8 sps:$4 sm:$0xff]  }
 0x8d0   :  { %2525 = vperm.xlu1 %2959, %v2522_v19   ;;  %v900_v19 = vld [vmem:[%s3755_s9 + $0x8] sm:$0xff] }
 0x932   :  { %v2951_v26 = vpop.permute.xlu0 %2950 }
 0x933   :  { %v2953_v28 = vunpack.i.h.bf16 %v2951_v26  ;;  %v2952_v31 = vunpack.i.l.bf16 %v2951_v26 }
 0x935   :  { %v768_v46 = vsel %vm96_vm1, %v662_v36, %v2953_v28  ;;  %v767_v35 = vsel %vm96_vm1, %v661_v33, %v2952_v31  ;;  %v2635_v28 = vcombine.high %v900_v19, %v904_v22  ;;  %v901_v31 = vld [vmem:[%s3755_s9 + $0x10] sm:$0xff]  ;;  %v902_v36 = vld [vmem:[%s3755_s9 + $0x18] sm:$0xff] }
 0x936   :  { %v2956_v37 = vpop.permute.xlu1 %2955  ;;  %v839_v38 = vpop.permute.xlu0 %838  ;;  %v905_v33 = vld [vmem:[%s3755_s9 + $0x30] sm:$0xff] }
 0x937   :  { %v2958_v39 = vunpack.i.h.bf16 %v2956_v37  ;;  %v2957_v40 = vunpack.i.l.bf16 %v2956_v37  ;;  %846 = vperm.xlu0 %2960, %v839_v38   ;;  %v906_v37 = vld [vmem:[%s3755_s9 + $0x38] sm:$0xff]  ;;  %v2632_v38 = vcombine.low %v899_v16, %v903_v18  ;;  %v3026_v16 = vld [vmem:[#allocation3 + $0x280] ss:$8 sps:$4 sm:$0xff]  }
 0x938   :  { %v3031_v18 = vld [vmem:[#allocation3 + $0xb4] ss:$8 sps:$4 sm:$0xff]  }
 0x939   :  { %v769_v41 = vsel %vm395_vm11, %v767_v35, %v2957_v40  ;;  %v770_v42 = vsel %vm395_vm11, %v768_v46, %v2958_v39  ;;  %v2634_v39 = vcombine.low %v900_v19, %v904_v22  ;;  %v2637_v40 = vcombine.high %v901_v31, %v905_v33  ;;  %v3034_v19 = vld [vmem:[#allocation3 + $0x294] ss:$8 sps:$4 sm:$0xff]   ;;  %v3029_v22 = vld [vmem:[#allocation3 + $0xb0] ss:$8 sps:$4 sm:$0xff]  }
 0x93a   :  { %v777_v34 = vpop.permute.xlu1 %776  ;;  %v771_v43 = vpack.c.bf16 %v770_v42, %v769_v41  ;;  %v2639_v46 = vcombine.high %v902_v36, %v906_v37  ;;  %v2636_v35 = vcombine.low %v901_v31, %v905_v33  ;;  %v2638_v41 = vcombine.low %v902_v36, %v906_v37  ;;  %v3043_v31 = vld [vmem:[#allocation3 + $0xd4] ss:$8 sps:$4 sm:$0xff]   ;;  %v3041_v36 = vld [vmem:[#allocation3 + $0xd0] ss:$8 sps:$4 sm:$0xff]  }
 0x93b   :  { %2888 = vmatpush3.bf16.msra.mxu1 %v777_v34  ;;  %v2971_v34 = vld [vmem:[#allocation3 + $0x4] ss:$8 sps:$4 sm:$0xff]   ;;  %v3046_v33 = vld [vmem:[#allocation3 + $0x2b4] ss:$8 sps:$4 sm:$0xff]   ;;  %v3044_v37 = vld [vmem:[#allocation3 + $0x2b0] ss:$8 sps:$4 sm:$0xff]  }
 0x93c   :  { %959 = vmatprep.subr.bf16.mxu1 %v2621_v0  ;;  %v3016_v0 = vld [vmem:[#allocation3 + $0x264] ss:$8 sps:$4 sm:$0xff]  }
 0x93e   :  { %2890 = vmatmul.mubr.msk.bf16.vlgmr.msra.gmra.mrb[16].mxu1 %vm166_vm2, %v771_v43  ;;  %v2980_v43 = vld [vmem:[#allocation3 + $0x204] ss:$8 sps:$4 sm:$0xff]  }
 0x93f   :  { %991 = vmatprep.mubr.bf16.mxu1 %v3289_v15  ;;  %960 = vmatpush1.bf16.msra.mxu1 %v2620_v63  ;;  %v3001_v63 = vld [vmem:[#allocation3 + $0x64] ss:$8 sps:$4 sm:$0xff]  }
 0x940   :  { %1041 = vmatprep.subr.bf16.mxu1 %v2625_v10  ;;  %v3011_v10 = vld [vmem:[#allocation3 + $0x80] ss:$8 sps:$4 sm:$0xff]  }
 0x94b   :  { %v844_v55 = vpop.permute.xlu1 %843 }
 0x94c   :  { %vm848_vm3 = vcmp.eq.s32.totalorder %v841_v47, %v844_v55  ;;  %v2998_v55 = vld [vmem:[#allocation3 + $0x234] ss:$8 sps:$4 sm:$0xff]  }
 0x94d   :  { %v850_v59 = vsel %vm848_vm3, 1.0, %v3280_v1 }
 0x9b6   :  { %v847_v50 = vpop.permute.xlu0 %846 }
 0x9b7   :  { %vm849_vm4 = vcmp.eq.s32.totalorder %v841_v47, %v847_v50  ;;  %v2974_v47 = vld [vmem:[#allocation3 + $0x14] ss:$8 sps:$4 sm:$0xff]   ;;  %v2984_v50 = vld [vmem:[#allocation3 + $0x210] ss:$8 sps:$4 sm:$0xff]  }
 0x9b8   :  { %v851_v60 = vsel %vm849_vm4, 1.0, %v3280_v1 }
 0x9b9   :  { %v852_v61 = vpack.c.bf16 %v851_v60, %v850_v59  ;;  %v3004_v59 = vld [vmem:[#allocation3 + $0x244] ss:$8 sps:$4 sm:$0xff]   ;;  %v2987_v60 = vld [vmem:[#allocation3 + $0x40] ss:$8 sps:$4 sm:$0xff]  }
 0xa11   :  { %v816_v44 = vpop.f32.mrb[16].mxu1 }
 0xa12   :  { %v823_v48 = vmul.f32 0.33333334, %v816_v44  ;;  %v2891_v49 = vpop.f32.mrb[17].mxu1  ;;  %v2969_v44 = vld [vmem:[#allocation3] ss:$8 sps:$4 sm:$0xff]  }
 0xa13   :  { %v819_v51 = vpop.f32.mrb[18].mxu1  ;;  %v2972_v49 = vld [vmem:[#allocation3 + $0x10] ss:$8 sps:$4 sm:$0xff]  }
 0xa14   :  { %v832_v52 = vadd.f32 %v2618_v45, %v823_v48  ;;  %v824_v53 = vmul.f32 0.33333334, %v819_v51  ;;  %v2892_v54 = vpop.f32.mrb[19].mxu1  ;;  %v2986_v48 = vld [vmem:[#allocation3 + $0x214] ss:$8 sps:$4 sm:$0xff]  }
 0xa15   :  { %v2977_v51 = vld [vmem:[#allocation3 + $0x24] ss:$8 sps:$4 sm:$0xff]   ;;  %v2983_v54 = vld [vmem:[#allocation3 + $0x34] ss:$8 sps:$4 sm:$0xff]  }
 0xa16   :  { %v833_v56 = vadd.f32 %v2618_v45, %v824_v53  ;;  %v834_v57 = vmax.f32 %v832_v52, 0.0  ;;  %v2978_v45 = vld [vmem:[#allocation3 + $0x200] ss:$8 sps:$4 sm:$0xff]   ;;  %v2992_v52 = vld [vmem:[#allocation3 + $0x224] ss:$8 sps:$4 sm:$0xff]  }
 0xa17   :  { %v2990_v53 = vld [vmem:[#allocation3 + $0x220] ss:$8 sps:$4 sm:$0xff]  }
 0xa18   :  { %v835_v58 = vmax.f32 %v833_v56, 0.0  ;;  %v2981_v56 = vld [vmem:[#allocation3 + $0x30] ss:$8 sps:$4 sm:$0xff]  }
 0xa1a   :  { %v853_v9 = vpack.c.bf16 %v835_v58, %v834_v57  ;;  %v2996_v57 = vld [vmem:[#allocation3 + $0x230] ss:$8 sps:$4 sm:$0xff]   ;;  %v2989_v58 = vld [vmem:[#allocation3 + $0x44] ss:$8 sps:$4 sm:$0xff]  }
 0xa1c   :  { %2894 = vmatpush3.bf16.msra.mxu0 %v853_v9  ;;  %v3002_v9 = vld [vmem:[#allocation3 + $0x240] ss:$8 sps:$4 sm:$0xff]  }
 0xa1d   :  { %1000 = vmatprep.subr.bf16.mxu0 %v2623_v4  ;;  %v3007_v4 = vld [vmem:[#allocation3 + $0x74] ss:$8 sps:$4 sm:$0xff]  }
 0xa1f   :  { %2896 = vmatmul.mubr.msk.bf16.vlgmr.msra.gmra.mrb[4].mxu0 %vm96_vm1, %v852_v61  ;;  %v2995_v61 = vld [vmem:[#allocation3 + $0x54] ss:$8 sps:$4 sm:$0xff]  }
 0xa20   :  { %1032 = vmatprep.mubr.bf16.mxu0 %v3289_v15  ;;  %1001 = vmatpush1.bf16.msra.mxu0 %v2622_v3  ;;  %v3014_v3 = vld [vmem:[#allocation3 + $0x260] ss:$8 sps:$4 sm:$0xff]  }
 0xa21   :  { %1082 = vmatprep.subr.bf16.mxu0 %v2627_v13  ;;  %v3023_v13 = vld [vmem:[#allocation3 + $0xa0] ss:$8 sps:$4 sm:$0xff]  }
 0xaf2   :  { %v891_v14 = vpop.f32.mrb[4].mxu0 }
 0xaf3   :  { %v2897_v17 = vpop.f32.mrb[5].mxu0  ;;  %v898_v42 = vpack.c.bf16 %v891_v14, %v891_v14  ;;  %v3025_v14 = vld [vmem:[#allocation3 + $0xa4] ss:$8 sps:$4 sm:$0xff]  }
 0xaf4   :  { %v894_v23 = vpop.f32.mrb[6].mxu0  ;;  %v3028_v17 = vld [vmem:[#allocation3 + $0x284] ss:$8 sps:$4 sm:$0xff]  }
 0xaf5   :  { %v907_v25 = vpack.c.bf16 %v894_v23, %v894_v23  ;;  %v2898_v26 = vpop.f32.mrb[7].mxu0  ;;  %v3032_v23 = vld [vmem:[#allocation3 + $0x290] ss:$8 sps:$4 sm:$0xff]  }
 0xaf6   :  { %v3037_v26 = vld [vmem:[#allocation3 + $0xc4] ss:$8 sps:$4 sm:$0xff]  }
 0xaf7   :  { %2628 = vmatmul.mubr.msk.bf16.vlgmr.msra.gmra.mrb[20].mxu1 %vm96_vm1, %v907_v25  ;;  %2629 = vmatmul.mubr.msk.bf16.vlgmr.msra.gmra.mrb[8].mxu0 %vm96_vm1, %v907_v25 }
 0xaf8   :  { %1042 = vmatpush1.bf16.msra.mxu1 %v2624_v8  ;;  %1083 = vmatpush1.bf16.msra.mxu0 %v2626_v12  ;;  %v3013_v8 = vld [vmem:[#allocation3 + $0x84] ss:$8 sps:$4 sm:$0xff]   ;;  %v3017_v12 = vld [vmem:[#allocation3 + $0x90] ss:$8 sps:$4 sm:$0xff]  }
 0xaf9   :  { %1073 = vmatprep.mubr.bf16.mxu1 %v3289_v15  ;;  %1114 = vmatprep.mubr.bf16.mxu0 %v3289_v15 }
 0xafa   :  { %1166 = vmatprep.subr.bf16.mxu1 %v2633_v27  ;;  %1207 = vmatprep.subr.bf16.mxu0 %v2635_v28  ;;  %v3038_v27 = vld [vmem:[#allocation3 + $0x2a0] ss:$8 sps:$4 sm:$0xff]   ;;  %v3040_v28 = vld [vmem:[#allocation3 + $0x2a4] ss:$8 sps:$4 sm:$0xff]  }
 0xaff   :  { %2630 = vmatmul.mubr.msk.bf16.vlgmr.msra.gmra.mrb[24].mxu1 %vm96_vm1, %v907_v25  ;;  %2631 = vmatmul.mubr.msk.bf16.vlgmr.msra.gmra.mrb[12].mxu0 %vm96_vm1, %v907_v25  ;;  %v3035_v25 = vld [vmem:[#allocation3 + $0xc0] ss:$8 sps:$4 sm:$0xff]  }
 0xb00   :  { %1167 = vmatpush1.bf16.msra.mxu1 %v2632_v38  ;;  %1208 = vmatpush1.bf16.msra.mxu0 %v2634_v39  ;;  %v3049_v38 = vld [vmem:[#allocation3 + $0xe4] ss:$8 sps:$4 sm:$0xff]  }
 0xb01   :  { %1198 = vmatprep.mubr.bf16.mxu1 %v3289_v15  ;;  %1239 = vmatprep.mubr.bf16.mxu0 %v3289_v15  ;;  %v3052_v39 = vld [vmem:[#allocation3 + $0x2c4] ss:$8 sps:$4 sm:$0xff]  }
 0xb02   :  { %1248 = vmatprep.subr.bf16.mxu1 %v2637_v40  ;;  %1289 = vmatprep.subr.bf16.mxu0 %v2639_v46  ;;  %v3047_v40 = vld [vmem:[#allocation3 + $0xe0] ss:$8 sps:$4 sm:$0xff]  }
 0xb03   :  { %v3050_v46 = vld [vmem:[#allocation3 + $0x2c0] ss:$8 sps:$4 sm:$0xff]  }
 0xb07   :  { %2640 = vmatmul.mubr.msk.bf16.vlgmr.msra.gmra.mrb[28].mxu1 %vm96_vm1, %v898_v42  ;;  %2641 = vmatmul.mubr.msk.bf16.vlgmr.msra.gmra.mrb[16].mxu0 %vm96_vm1, %v898_v42 }
 0xb08   :  { %1249 = vmatpush1.bf16.msra.mxu1 %v2636_v35  ;;  %1290 = vmatpush1.bf16.msra.mxu0 %v2638_v41  ;;  %v3053_v35 = vld [vmem:[#allocation3 + $0xf0] ss:$8 sps:$4 sm:$0xff]   ;;  %v3055_v41 = vld [vmem:[#allocation3 + $0xf4] ss:$8 sps:$4 sm:$0xff]  }
 0xb09   :  { %1280 = vmatprep.mubr.bf16.mxu1 %v3289_v15  ;;  %1321 = vmatprep.mubr.bf16.mxu0 %v3289_v15  ;;  %v2975_v15 = vld [vmem:[#allocation3 + $0x20] ss:$8 sps:$4 sm:$0xff]  }
 0xb0a   :  { %2176 = vmatprep.subr.bf16.mxu0 %v2971_v34  ;;  %2258 = vmatprep.subr.bf16.mxu1 %v2980_v43  ;;  %v3058_v34 = vld [vmem:[#allocation3 + $0x2d4] ss:$8 sps:$4 sm:$0xff]   ;;  %v3061_v43 = vld [vmem:[#allocation3 + $0x104] ss:$8 sps:$4 sm:$0xff]  }
 0xb0f   :  { %2642 = vmatmul.mubr.msk.bf16.vlgmr.msra.gmra.mrb[32].mxu1 %vm96_vm1, %v898_v42  ;;  %2643 = vmatmul.mubr.msk.bf16.vlgmr.msra.gmra.mrb[20].mxu0 %vm96_vm1, %v898_v42  ;;  %v3056_v42 = vld [vmem:[#allocation3 + $0x2d0] ss:$8 sps:$4 sm:$0xff]   ;;  %vm2532_vm1 = vcmask 523264  }
 0xb10   :  { %2177 = vmatpush1.bf16.msra.mxu0 %v2969_v44  ;;  %2259 = vmatpush1.bf16.msra.mxu1 %v2978_v45  ;;  %v3064_v44 = vld [vmem:[#allocation3 + $0x2e4] ss:$8 sps:$4 sm:$0xff]   ;;  %v3062_v45 = vld [vmem:[#allocation3 + $0x2e0] ss:$8 sps:$4 sm:$0xff]  }
 0xb11   :  { %2178 = vmatprep.subr.bf16.mxu0 %v2974_v47  ;;  %2260 = vmatprep.subr.bf16.mxu1 %v2986_v48  ;;  %v3068_v47 = vld [vmem:[#allocation3 + $0x2f0] ss:$8 sps:$4 sm:$0xff]   ;;  %v3070_v48 = vld [vmem:[#allocation3 + $0x2f4] ss:$8 sps:$4 sm:$0xff]  }
 0xb14   :  { %2179 = vmatpush1.bf16.msra.mxu0 %v2972_v49  ;;  %2261 = vmatpush1.bf16.msra.mxu1 %v2984_v50  ;;  %v3076_v49 = vld [vmem:[#allocation3 + $0x304] ss:$8 sps:$4 sm:$0xff]  }
 0xb15   :  { %2180 = vmatprep.subr.bf16.mxu0 %v2977_v51  ;;  %2262 = vmatprep.subr.bf16.mxu1 %v2992_v52 }
 0xb18   :  { %2181 = vmatpush1.bf16.msra.mxu0 %v2975_v15  ;;  %2263 = vmatpush1.bf16.msra.mxu1 %v2990_v53 }
 0xb19   :  { %2182 = vmatprep.subr.bf16.mxu0 %v2983_v54  ;;  %2264 = vmatprep.subr.bf16.mxu1 %v2998_v55 }
 0xb1c   :  { %2183 = vmatpush1.bf16.msra.mxu0 %v2981_v56  ;;  %2265 = vmatpush1.bf16.msra.mxu1 %v2996_v57 }
 0xb1d   :  { %2184 = vmatprep.subr.bf16.mxu0 %v2989_v58  ;;  %2266 = vmatprep.subr.bf16.mxu1 %v3004_v59 }
 0xb20   :  { %2185 = vmatpush1.bf16.msra.mxu0 %v2987_v60  ;;  %2267 = vmatpush1.bf16.msra.mxu1 %v3002_v9 }
 0xb21   :  { %2186 = vmatprep.subr.bf16.mxu0 %v2995_v61  ;;  %2268 = vmatprep.subr.bf16.mxu1 %v3010_v21 }
 0xb24   :  { %2187 = vmatpush1.bf16.msra.mxu0 %v2993_v62  ;;  %2269 = vmatpush1.bf16.msra.mxu1 %v3008_v20  ;;  %v1330_v20 = vld [vmem:[%s3757_s11] sm:$0xff] }
 0xb25   :  { %2188 = vmatprep.subr.bf16.mxu0 %v3001_v63  ;;  %2270 = vmatprep.subr.bf16.mxu1 %v3016_v0  ;;  %v1346_v63 = vsub.s32 3, %v3444_v24  ;;  %v1335_v0 = vrot.slane %v1330_v20, %v3456_v32 }
 0xb28   :  { %2189 = vmatpush1.bf16.msra.mxu0 %v2999_v2  ;;  %2271 = vmatpush1.bf16.msra.mxu1 %v3014_v3  ;;  %v1343_v2 = vrot.slane %v1330_v20, %v3453_v30  ;;  %v1350_v30 = vsub.s32 4, %v3444_v24 }
 0xb29   :  { %2190 = vmatprep.subr.bf16.mxu0 %v3007_v4  ;;  %2272 = vmatprep.subr.bf16.mxu1 %v3022_v5  ;;  %v1339_v5 = vrot.slane %v1330_v20, %v3450_v29 }
 0xb2c   :  { %2191 = vmatpush1.bf16.msra.mxu0 %v3005_v6  ;;  %2273 = vmatpush1.bf16.msra.mxu1 %v3020_v7  ;;  %v1347_v6 = vrot.slane %v1330_v20, %v1346_v63 }
 0xb2d   :  { %2192 = vmatprep.subr.bf16.mxu0 %v3013_v8  ;;  %2274 = vmatprep.subr.bf16.mxu1 %v3028_v17 }
 0xb30   :  { %2193 = vmatpush1.bf16.msra.mxu0 %v3011_v10  ;;  %2275 = vmatpush1.bf16.msra.mxu1 %v3026_v16 }
 0xb31   :  { %2194 = vmatprep.subr.bf16.mxu0 %v3019_v11  ;;  %2276 = vmatprep.subr.bf16.mxu1 %v3034_v19 }
 0xb34   :  { %2195 = vmatpush1.bf16.msra.mxu0 %v3017_v12  ;;  %2277 = vmatpush1.bf16.msra.mxu1 %v3032_v23  ;;  %v1358_v23 = vsub.s32 6, %v3444_v24 }
 0xb35   :  { %2196 = vmatprep.subr.bf16.mxu0 %v3025_v14  ;;  %2278 = vmatprep.subr.bf16.mxu1 %v3040_v28  ;;  %v1362_v28 = vsub.s32 7, %v3444_v24 }
 0xb38   :  { %2197 = vmatpush1.bf16.msra.mxu0 %v3023_v13  ;;  %2279 = vmatpush1.bf16.msra.mxu1 %v3038_v27  ;;  %v1354_v27 = vsub.s32 5, %v3444_v24 }
 0xb39   :  { %2198 = vmatprep.subr.bf16.mxu0 %v3031_v18  ;;  %2280 = vmatprep.subr.bf16.mxu1 %v3046_v33 }
 0xb3c   :  { %2199 = vmatpush1.bf16.msra.mxu0 %v3029_v22  ;;  %2281 = vmatpush1.bf16.msra.mxu1 %v3044_v37  ;;  %v1351_v37 = vrot.slane %v1330_v20, %v1350_v30  ;;  %v3103_v30 = vld [vmem:[#allocation3 + $0x174] ss:$8 sps:$4 sm:$0xff]  }
 0xb3d   :  { %2200 = vmatprep.subr.bf16.mxu0 %v3037_v26  ;;  %2282 = vmatprep.subr.bf16.mxu1 %v3052_v39 }
 0xb40   :  { %2201 = vmatpush1.bf16.msra.mxu0 %v3035_v25  ;;  %2283 = vmatpush1.bf16.msra.mxu1 %v3050_v46 }
 0xb41   :  { %2202 = vmatprep.subr.bf16.mxu0 %v3043_v31  ;;  %2284 = vmatprep.subr.bf16.mxu1 %v3058_v34 }
 0xb44   :  { %2203 = vmatpush1.bf16.msra.mxu0 %v3041_v36  ;;  %2285 = vmatpush1.bf16.msra.mxu1 %v3056_v42  ;;  %v3059_v42 = vld [vmem:[#allocation3 + $0x100] ss:$8 sps:$4 sm:$0xff]  }
 0xb45   :  { %2204 = vmatprep.subr.bf16.mxu0 %v3049_v38  ;;  %2286 = vmatprep.subr.bf16.mxu1 %v3064_v44  ;;  %v1359_v38 = vrot.slane %v1330_v20, %v1358_v23  ;;  %v3106_v23 = vld [vmem:[#allocation3 + $0x354] ss:$8 sps:$4 sm:$0xff]  }
 0xb48   :  { %2205 = vmatpush1.bf16.msra.mxu0 %v3047_v40  ;;  %2287 = vmatpush1.bf16.msra.mxu1 %v3062_v45 }
 0xb49   :  { %2206 = vmatprep.subr.bf16.mxu0 %v3055_v41  ;;  %2288 = vmatprep.subr.bf16.mxu1 %v3070_v48  ;;  %v1363_v41 = vrot.slane %v1330_v20, %v1362_v28  ;;  %v3067_v48 = vld [vmem:[#allocation3 + $0x114] ss:$8 sps:$4 sm:$0xff]   ;;  %v3112_v28 = vld [vmem:[#allocation3 + $0x364] ss:$8 sps:$4 sm:$0xff]  }
 0xb4c   :  { %2207 = vmatpush1.bf16.msra.mxu0 %v3053_v35  ;;  %2289 = vmatpush1.bf16.msra.mxu1 %v3068_v47  ;;  %v1355_v35 = vrot.slane %v1330_v20, %v1354_v27  ;;  %v3074_v20 = vld [vmem:[#allocation3 + $0x300] ss:$8 sps:$4 sm:$0xff]   ;;  %v3109_v27 = vld [vmem:[#allocation3 + $0x184] ss:$8 sps:$4 sm:$0xff]  }
 0xb4d   :  { %2217 = vmatprep.subr.bf16.mxu0 %v3061_v43  ;;  %2299 = vmatprep.subr.bf16.mxu1 %v3076_v49 }
 0xbca   :  { %v993_v50 = vpop.f32.mrb[20].mxu1  ;;  %v1034_v51 = vpop.f32.mrb[8].mxu0 }
 0xbcb   :  { %v995_v52 = vpop.f32.mrb[21].mxu1  ;;  %v1036_v15 = vpop.f32.mrb[9].mxu0 }
 0xbcc   :  { %v997_v53 = vpop.f32.mrb[22].mxu1  ;;  %v1038_v54 = vpop.f32.mrb[10].mxu0 }
 0xbcd   :  { %v998_v55 = vpop.f32.mrb[23].mxu1  ;;  %v1039_v56 = vpop.f32.mrb[11].mxu0 }
 0xbd2   :  { %v1075_v57 = vpop.f32.mrb[24].mxu1  ;;  %v1116_v58 = vpop.f32.mrb[12].mxu0 }
 0xbd3   :  { %v1077_v59 = vpop.f32.mrb[25].mxu1  ;;  %v1118_v60 = vpop.f32.mrb[13].mxu0 }
 0xbd4   :  { %v1079_v9 = vpop.f32.mrb[26].mxu1  ;;  %v1120_v61 = vpop.f32.mrb[14].mxu0 }
 0xbd5   :  { %v1080_v21 = vpop.f32.mrb[27].mxu1  ;;  %v1121_v62 = vpop.f32.mrb[15].mxu0  ;;  %v3073_v61 = vld [vmem:[#allocation3 + $0x124] ss:$8 sps:$4 sm:$0xff]  }
 0xbd6   :  { %v3071_v62 = vld [vmem:[#allocation3 + $0x120] ss:$8 sps:$4 sm:$0xff]  }
 0xbda   :  { %v1200_v3 = vpop.f32.mrb[28].mxu1  ;;  %v1241_v4 = vpop.f32.mrb[16].mxu0 }
 0xbdb   :  { %v1201_v7 = vadd.f32 %v1200_v3, %v993_v50  ;;  %v1242_v8 = vadd.f32 %v1241_v4, %v1034_v51  ;;  %v1202_v10 = vpop.f32.mrb[29].mxu1  ;;  %v1243_v11 = vpop.f32.mrb[17].mxu0  ;;  %v3077_v4 = vld [vmem:[#allocation3 + $0x130] ss:$8 sps:$4 sm:$0xff]  }
 0xbdc   :  { %v1203_v12 = vadd.f32 %v1202_v10, %v995_v52  ;;  %v1244_v13 = vadd.f32 %v1243_v11, %v1036_v15  ;;  %v1204_v14 = vpop.f32.mrb[30].mxu1  ;;  %v1245_v16 = vpop.f32.mrb[18].mxu0  ;;  %v3086_v10 = vld [vmem:[#allocation3 + $0x320] ss:$8 sps:$4 sm:$0xff]   ;;  %v3091_v11 = vld [vmem:[#allocation3 + $0x154] ss:$8 sps:$4 sm:$0xff]  }
 0xbdd   :  { %v1372_v17 = vadd.f32 %v1335_v0, %v1201_v7  ;;  %v3661_v18 = vadd.f32 %v1343_v2, %v1242_v8  ;;  %v1205_v19 = vpop.f32.mrb[31].mxu1  ;;  %v1246_v22 = vpop.f32.mrb[19].mxu0  ;;  %v3079_v0 = vld [vmem:[#allocation3 + $0x134] ss:$8 sps:$4 sm:$0xff]   ;;  %v3088_v7 = vld [vmem:[#allocation3 + $0x324] ss:$8 sps:$4 sm:$0xff]  }
 0xbde   :  { %v1373_v25 = vadd.f32 %v1339_v5, %v1203_v12  ;;  %v1375_v26 = vadd.f32 %v1347_v6, %v1244_v13  ;;  %v3082_v2 = vld [vmem:[#allocation3 + $0x314] ss:$8 sps:$4 sm:$0xff]   ;;  %v3080_v5 = vld [vmem:[#allocation3 + $0x310] ss:$8 sps:$4 sm:$0xff]   ;;  %v3085_v6 = vld [vmem:[#allocation3 + $0x144] ss:$8 sps:$4 sm:$0xff]  }
 0xbdf   :  { %v1380_v31 = vmax.f32 %v1372_v17, 0.0  ;;  %v3083_v8 = vld [vmem:[#allocation3 + $0x140] ss:$8 sps:$4 sm:$0xff]   ;;  %v3094_v12 = vld [vmem:[#allocation3 + $0x334] ss:$8 sps:$4 sm:$0xff]  }
 0xbe0   :  { %v1381_v33 = vmax.f32 %v1373_v25, 0.0  ;;  %v1383_v36 = vmax.f32 %v1375_v26, 0.0  ;;  %v3089_v13 = vld [vmem:[#allocation3 + $0x150] ss:$8 sps:$4 sm:$0xff]   ;;  %v3097_v16 = vld [vmem:[#allocation3 + $0x164] ss:$8 sps:$4 sm:$0xff]  }
 0xbe1   :  { %v1388_v34 = vpack.c.bf16 %v1380_v31, %v1380_v31  ;;  %v3092_v14 = vld [vmem:[#allocation3 + $0x330] ss:$8 sps:$4 sm:$0xff]   ;;  %v3100_v17 = vld [vmem:[#allocation3 + $0x344] ss:$8 sps:$4 sm:$0xff]   ;;  %v3095_v19 = vld [vmem:[#allocation3 + $0x160] ss:$8 sps:$4 sm:$0xff]  }
 0xbe2   :  { %v1389_v39 = vpack.c.bf16 %v1381_v33, %v1381_v33  ;;  %v1282_v40 = vpop.f32.mrb[32].mxu1  ;;  %v1323_v46 = vpop.f32.mrb[20].mxu0  ;;  %v1391_v49 = vpack.c.bf16 %v1383_v36, %v1383_v36  ;;  %v3098_v22 = vld [vmem:[#allocation3 + $0x340] ss:$8 sps:$4 sm:$0xff]   ;;  %v3101_v25 = vld [vmem:[#allocation3 + $0x170] ss:$8 sps:$4 sm:$0xff]  }
 0xbe3   :  { %v1283_v43 = vadd.f32 %v1282_v40, %v1075_v57  ;;  %v1324_v44 = vadd.f32 %v1323_v46, %v1116_v58  ;;  %v1284_v45 = vpop.f32.mrb[33].mxu1  ;;  %v1325_v47 = vpop.f32.mrb[21].mxu0  ;;  %v3065_v57 = vld [vmem:[#allocation3 + $0x110] ss:$8 sps:$4 sm:$0xff]   ;;  %v3107_v31 = vld [vmem:[#allocation3 + $0x180] ss:$8 sps:$4 sm:$0xff]  }
 0xbe4   :  { %v1285_v50 = vadd.f32 %v1284_v45, %v1077_v59  ;;  %v1326_v24 = vadd.f32 %v1325_v47, %v1118_v60  ;;  %v1286_v51 = vpop.f32.mrb[34].mxu1  ;;  %v1327_v52 = vpop.f32.mrb[22].mxu0  ;;  %2208 = vmatprep.mubr.bf16.mxu0 %v1389_v39  ;;  %v3104_v26 = vld [vmem:[#allocation3 + $0x350] ss:$8 sps:$4 sm:$0xff]   ;;  %v3110_v33 = vld [vmem:[#allocation3 + $0x360] ss:$8 sps:$4 sm:$0xff]  }
 0xbe5   :  { %v1376_v15 = vadd.f32 %v1351_v37, %v1283_v43  ;;  %v3667_v53 = vadd.f32 %v1359_v38, %v1324_v44  ;;  %v1287_v54 = vpop.f32.mrb[35].mxu1  ;;  %v1328_v55 = vpop.f32.mrb[23].mxu0  ;;  %2209 = vmatmul.mubr.bf16.vlgmr.msra.gmra.mrb[24].mxu0 %v1388_v34  ;;  %v3115_v36 = vld [vmem:[#allocation3 + $0x194] ss:$8 sps:$4 sm:$0xff]   ;;  %v3113_v38 = vld [vmem:[#allocation3 + $0x190] ss:$8 sps:$4 sm:$0xff]  }
 0xbe6   :  { %v1377_v56 = vadd.f32 %v1355_v35, %v1285_v50  ;;  %v1379_v9 = vadd.f32 %v1363_v41, %v1326_v24  ;;  %2218 = vmatpush1.bf16.msra.mxu0 %v3059_v42  ;;  %2249 = vmatprep.mubr.bf16.mxu0 %v1391_v49  ;;  %v3118_v37 = vld [vmem:[#allocation3 + $0x374] ss:$8 sps:$4 sm:$0xff]   ;;  %v3116_v39 = vld [vmem:[#allocation3 + $0x370] ss:$8 sps:$4 sm:$0xff]   ;;  %v3121_v40 = vld [vmem:[#allocation3 + $0x1a4] ss:$8 sps:$4 sm:$0xff]  }
 0xbe7   :  { %v1384_v58 = vmax.f32 %v1376_v15, 0.0  ;;  %2219 = vmatprep.subr.bf16.mxu0 %v3067_v48  ;;  %v3124_v46 = vld [vmem:[#allocation3 + $0x384] ss:$8 sps:$4 sm:$0xff]   ;;  %v3119_v35 = vld [vmem:[#allocation3 + $0x1a0] ss:$8 sps:$4 sm:$0xff]  }
 0xbe8   :  { %v1385_v21 = vmax.f32 %v1377_v56, 0.0  ;;  %v1387_v59 = vmax.f32 %v1379_v9, 0.0  ;;  %v3122_v41 = vld [vmem:[#allocation3 + $0x380] ss:$8 sps:$4 sm:$0xff]   ;;  %v3127_v42 = vld [vmem:[#allocation3 + $0x1b4] ss:$8 sps:$4 sm:$0xff]  }
 0xbe9   :  { %v1392_v63 = vpack.c.bf16 %v1384_v58, %v1384_v58  ;;  %v3130_v34 = vld [vmem:[#allocation3 + $0x394] ss:$8 sps:$4 sm:$0xff]   ;;  %v3125_v43 = vld [vmem:[#allocation3 + $0x1b0] ss:$8 sps:$4 sm:$0xff]   ;;  %v3133_v45 = vld [vmem:[#allocation3 + $0x1c4] ss:$8 sps:$4 sm:$0xff]  }
 0xbea   :  { %v1393_v60 = vpack.c.bf16 %v1385_v21, %v1385_v21  ;;  %2220 = vmatpush1.bf16.msra.mxu0 %v3065_v57  ;;  %v1395_v3 = vpack.c.bf16 %v1387_v59, %v1387_v59  ;;  %v3128_v44 = vld [vmem:[#allocation3 + $0x390] ss:$8 sps:$4 sm:$0xff]   ;;  %v3136_v47 = vld [vmem:[#allocation3 + $0x3a4] ss:$8 sps:$4 sm:$0xff]   ;;  %v3131_v48 = vld [vmem:[#allocation3 + $0x1c0] ss:$8 sps:$4 sm:$0xff]  }
 0xbeb   :  { %2221 = vmatprep.subr.bf16.mxu0 %v3073_v61  ;;  %v3134_v49 = vld [vmem:[#allocation3 + $0x3a0] ss:$8 sps:$4 sm:$0xff]   ;;  %v3139_v50 = vld [vmem:[#allocation3 + $0x1d4] ss:$8 sps:$4 sm:$0xff]   ;;  %v3137_v51 = vld [vmem:[#allocation3 + $0x1d0] ss:$8 sps:$4 sm:$0xff]  }
 0xbec   :  { %2290 = vmatprep.mubr.bf16.mxu1 %v1393_v60  ;;  %v3142_v24 = vld [vmem:[#allocation3 + $0x3b4] ss:$8 sps:$4 sm:$0xff]   ;;  %v3140_v52 = vld [vmem:[#allocation3 + $0x3b0] ss:$8 sps:$4 sm:$0xff]   ;;  %v3145_v15 = vld [vmem:[#allocation3 + $0x1e4] ss:$8 sps:$4 sm:$0xff]  }
 0xbed   :  { %2291 = vmatmul.mubr.bf16.vlgmr.msra.gmra.mrb[36].mxu1 %v1392_v63  ;;  %v3148_v54 = vld [vmem:[#allocation3 + $0x3c4] ss:$8 sps:$4 sm:$0xff]   ;;  %v3143_v55 = vld [vmem:[#allocation3 + $0x1e0] ss:$8 sps:$4 sm:$0xff]   ;;  %v3151_v9 = vld [vmem:[#allocation3 + $0x1f4] ss:$8 sps:$4 sm:$0xff]  }
 0xbee   :  { %2222 = vmatpush1.bf16.msra.mxu0 %v3071_v62  ;;  %2300 = vmatpush1.bf16.msra.mxu1 %v3074_v20  ;;  %v3146_v56 = vld [vmem:[#allocation3 + $0x3c0] ss:$8 sps:$4 sm:$0xff]   ;;  %v3154_v57 = vld [vmem:[#allocation3 + $0x3d4] ss:$8 sps:$4 sm:$0xff]   ;;  %v3149_v58 = vld [vmem:[#allocation3 + $0x1f0] ss:$8 sps:$4 sm:$0xff]  }
 0xbef   :  { %2331 = vmatprep.mubr.bf16.mxu1 %v1395_v3  ;;  %2223 = vmatprep.subr.bf16.mxu0 %v3079_v0  ;;  %v3152_v61 = vld [vmem:[#allocation3 + $0x3d0] ss:$8 sps:$4 sm:$0xff]   ;;  %v1382_v21 = vmax.f32 %v3661_v18, 0.0  ;;  %v3157_v59 = vld [vmem:[#allocation3 + $0x3e4] ss:$8 sps:$4 sm:$0xff]  }
 0xbf0   :  { %2301 = vmatprep.subr.bf16.mxu1 %v3082_v2  ;;  %v3161_v60 = vld [vmem:[%s3760_s14 + $0x40] sm:$0xff]   ;;  %v3163_v18 = vld [vmem:[%s3760_s14 + $0x48] sm:$0xff]   ;;  %v3158_v2 = vld [vmem:[#allocation3 + $0x3f0] ss:$8 sps:$4 sm:$0xff]  }
 0xbf1   :  { %v3155_v62 = vld [vmem:[#allocation3 + $0x3e0] ss:$8 sps:$4 sm:$0xff]   ;;  %v1390_v63 = vpack.c.bf16 %v1382_v21, %v1382_v21  ;;  %v3160_v0 = vld [vmem:[#allocation3 + $0x3f4] ss:$8 sps:$4 sm:$0xff]  }
 0xbf2   :  { %2224 = vmatpush1.bf16.msra.mxu0 %v3077_v4  ;;  %2302 = vmatpush1.bf16.msra.mxu1 %v3080_v5  ;;  %v3162_v20 = vld [vmem:[%s3760_s14] sm:$0xff]   ;;  %v3164_v3 = vld [vmem:[%s3760_s14 + $0x8] sm:$0xff]   ;;  %v1386_v4 = vmax.f32 %v3667_v53, 0.0  ;;  %v3165_v5 = vld [vmem:[%s3760_s14 + $0x50] sm:$0xff]  }
 0xbf3   :  { %2225 = vmatprep.subr.bf16.mxu0 %v3085_v6  ;;  %2303 = vmatprep.subr.bf16.mxu1 %v3088_v7  ;;  %v3166_v6 = vld [vmem:[%s3760_s14 + $0x10] sm:$0xff]   ;;  %v3168_v53 = vld [vmem:[%s3760_s14 + $0x18] sm:$0xff]  }
 0xbf4   :  { %v1394_v7 = vpack.c.bf16 %v1386_v4, %v1386_v4 }
 0xbf6   :  { %2226 = vmatpush1.bf16.msra.mxu0 %v3083_v8  ;;  %2304 = vmatpush1.bf16.msra.mxu1 %v3086_v10  ;;  %v3167_v8 = vld [vmem:[%s3760_s14 + $0x58] sm:$0xff]   ;;  %v3169_v10 = vld [vmem:[%s3760_s14 + $0x60] sm:$0xff]  }
 0xbf7   :  { %2227 = vmatprep.subr.bf16.mxu0 %v3091_v11  ;;  %2305 = vmatprep.subr.bf16.mxu1 %v3094_v12  ;;  %v3170_v11 = vld [vmem:[%s3760_s14 + $0x20] sm:$0xff]   ;;  %v3171_v12 = vld [vmem:[%s3760_s14 + $0x68] sm:$0xff]  }
 0xbfa   :  { %2228 = vmatpush1.bf16.msra.mxu0 %v3089_v13  ;;  %2306 = vmatpush1.bf16.msra.mxu1 %v3092_v14  ;;  %v3172_v13 = vld [vmem:[%s3760_s14 + $0x28] sm:$0xff]   ;;  %v3173_v14 = vld [vmem:[%s3760_s14 + $0x70] sm:$0xff]  }
 0xbfb   :  { %2229 = vmatprep.subr.bf16.mxu0 %v3097_v16  ;;  %2307 = vmatprep.subr.bf16.mxu1 %v3100_v17  ;;  %v3174_v16 = vld [vmem:[%s3760_s14 + $0x30] sm:$0xff]   ;;  %v3175_v17 = vld [vmem:[%s3760_s14 + $0x78] sm:$0xff]  }
 0xbfe   :  { %2230 = vmatpush1.bf16.msra.mxu0 %v3095_v19  ;;  %2308 = vmatpush1.bf16.msra.mxu1 %v3098_v22  ;;  %v3176_v19 = vld [vmem:[%s3760_s14 + $0x38] sm:$0xff]   ;;  %v1524_v22 = vld [vmem:[%s3759_s13] sm:$0x3] }
 0xbff   :  { %2231 = vmatprep.subr.bf16.mxu0 %v3103_v30  ;;  %2309 = vmatprep.subr.bf16.mxu1 %v3106_v23 }
 0xc02   :  { %2232 = vmatpush1.bf16.msra.mxu0 %v3101_v25  ;;  %2310 = vmatpush1.bf16.msra.mxu1 %v3104_v26  ;;  %v1529_v26 = vrot.slane %v1524_v22, %v3456_v32 }
 0xc03   :  { %2233 = vmatprep.subr.bf16.mxu0 %v3109_v27  ;;  %2311 = vmatprep.subr.bf16.mxu1 %v3112_v28  ;;  %v1533_v28 = vrot.slane %v1524_v22, %v3450_v29  ;;  %v2772_v29 = vld [vmem:[%s3761_s15] ss:$0 sm:$0xff]  ;;  %s3291_s15 = smov [#allocation6]  }
 0xc04   :  { %s2594_s21 = sshll.u32 %s3291_s15, 4  ;;  %s2595_s21 = int_to_ptr.vmem [resolvable:$true] %s2594_s21 }
 0xc05   :  { %s3255_s22 = scalar_lea.vmem %s2595_s21, 32  ;;  %p3256_p9 = scmp.lt.s32.totalorder %s2595_s21, %s2595_s21 }
 0xc06   :  { %2234 = vmatpush1.bf16.msra.mxu0 %v3107_v31  ;;  %2312 = vmatpush1.bf16.msra.mxu1 %v3110_v33 }
 0xc07   :  { %2235 = vmatprep.subr.bf16.mxu0 %v3115_v36  ;;  %2313 = vmatprep.subr.bf16.mxu1 %v3118_v37 }
 0xc0a   :  { %2236 = vmatpush1.bf16.msra.mxu0 %v3113_v38  ;;  %2314 = vmatpush1.bf16.msra.mxu1 %v3116_v39 }
 0xc0b   :  { %2237 = vmatprep.subr.bf16.mxu0 %v3121_v40  ;;  %2315 = vmatprep.subr.bf16.mxu1 %v3124_v46 }
 0xc0e   :  { %2238 = vmatpush1.bf16.msra.mxu0 %v3119_v35  ;;  %2316 = vmatpush1.bf16.msra.mxu1 %v3122_v41 }
 0xc0f   :  { %2239 = vmatprep.subr.bf16.mxu0 %v3127_v42  ;;  %2317 = vmatprep.subr.bf16.mxu1 %v3130_v34 }
 0xc12   :  { %2240 = vmatpush1.bf16.msra.mxu0 %v3125_v43  ;;  %2318 = vmatpush1.bf16.msra.mxu1 %v3128_v44 }
 0xc13   :  { %2241 = vmatprep.subr.bf16.mxu0 %v3133_v45  ;;  %2319 = vmatprep.subr.bf16.mxu1 %v3136_v47 }
 0xc16   :  { %2242 = vmatpush1.bf16.msra.mxu0 %v3131_v48  ;;  %2320 = vmatpush1.bf16.msra.mxu1 %v3134_v49 }
 0xc17   :  { %2243 = vmatprep.subr.bf16.mxu0 %v3139_v50  ;;  %2321 = vmatprep.subr.bf16.mxu1 %v3142_v24 }
 0xc1a   :  { %2244 = vmatpush1.bf16.msra.mxu0 %v3137_v51  ;;  %2322 = vmatpush1.bf16.msra.mxu1 %v3140_v52  ;;  %v2520_v52 = vld [vmem:[%s3762_s16] sm:$0x1]  ;;  %s3251_s16 = scalar_lea.vmem %s2595_s21, 16 }
 0xc1b   :  { %2245 = vmatprep.subr.bf16.mxu0 %v3145_v15  ;;  %2323 = vmatprep.subr.bf16.mxu1 %v3148_v54  ;;  %p3252_p8 = scmp.ne.s32.totalorder %s2595_s21, %s3251_s16  ;;  %p3257_p10 = scmp.lt.s32.totalorder %s3255_s22, %s3251_s16 }
 0xc1d   :  { %p3258_p11 = por %p3257_p10, %p3256_p9 }
 0xc1e   :  { %2246 = vmatpush1.bf16.msra.mxu0 %v3143_v55  ;;  %2324 = vmatpush1.bf16.msra.mxu1 %v3146_v56 }
 0xc1f   :  { %2247 = vmatprep.subr.bf16.mxu0 %v3151_v9  ;;  %2325 = vmatprep.subr.bf16.mxu1 %v3154_v57  ;;  %p3259_p12 = pnand %p3258_p11, %p3252_p8 }
 0xc22   :  { %2248 = vmatpush1.bf16.msra.mxu0 %v3149_v58  ;;  %2326 = vmatpush1.bf16.msra.mxu1 %v3152_v61 }
 0xc23   :  { %2327 = vmatprep.subr.bf16.mxu1 %v3157_v59  ;;  %2817 = vmatprep.subr.bf16.mxu0 %v3161_v60 }
 0xc25   :  { %2250 = vmatmul.mubr.bf16.vlgmr.msra.gmra.mrb[24].mxu0 %v1390_v63 }
 0xc26   :  { %2328 = vmatpush1.bf16.msra.mxu1 %v3155_v62  ;;  %2818 = vmatpush3.bf16.msra.mxu0 %v3162_v20 }
 0xc27   :  { %2329 = vmatprep.subr.bf16.mxu1 %v3160_v0  ;;  %2819 = vmatprep.subr.bf16.mxu0 %v3163_v18 }
 0xc2a   :  { %2330 = vmatpush1.bf16.msra.mxu1 %v3158_v2  ;;  %2820 = vmatpush3.bf16.msra.mxu0 %v3164_v3 }
 0xc2b   :  { %2821 = vmatprep.subr.bf16.mxu0 %v3165_v5 }
 0xc2d   :  { %2332 = vmatmul.mubr.bf16.vlgmr.msra.gmra.mrb[36].mxu1 %v1394_v7 }
 0xc2e   :  { %2822 = vmatpush3.bf16.msra.mxu0 %v3166_v6 }
 0xc2f   :  { %2823 = vmatprep.subr.bf16.mxu0 %v3167_v8 }
 0xc32   :  { %2824 = vmatpush3.bf16.msra.mxu0 %v3168_v53 }
 0xc33   :  { %2825 = vmatprep.subr.bf16.mxu0 %v3169_v10 }
 0xc36   :  { %2826 = vmatpush3.bf16.msra.mxu0 %v3170_v11 }
 0xc37   :  { %2827 = vmatprep.subr.bf16.mxu0 %v3171_v12 }
 0xc3a   :  { %2828 = vmatpush3.bf16.msra.mxu0 %v3172_v13 }
 0xc3b   :  { %2829 = vmatprep.subr.bf16.mxu0 %v3173_v14 }
 0xc3e   :  { %2830 = vmatpush3.bf16.msra.mxu0 %v3174_v16 }
 0xc3f   :  { %2831 = vmatprep.subr.bf16.mxu0 %v3175_v17 }
 0xc42   :  { %2832 = vmatpush3.bf16.msra.mxu0 %v3176_v19 }
 0xc43   :  { %2899 = vmatprep.subr.bf16.mxu0 %v3280_v1 }
 0xcf8   :  { %v2251_v30 = vpop.f32.mrb[24].mxu0 }
 0xcf9   :  { %v2253_v23 = vpop.f32.mrb[25].mxu0  ;;  %v2905_v31 = vadd.f32 %v2251_v30, %v1529_v26 }
 0xcfa   :  { %v2255_v25 = vpop.f32.mrb[26].mxu0  ;;  %v2907_v33 = vadd.f32 %v2253_v23, %v1533_v28 }
 0xcfb   :  { %v2256_v27 = vpop.f32.mrb[27].mxu0 }
 0xd00   :  { %v2333_v36 = vpop.f32.mrb[36].mxu1 }
 0xd01   :  { %v2906_v37 = vadd.f32 %v2905_v31, %v2333_v36  ;;  %v2335_v38 = vpop.f32.mrb[37].mxu1 }
 0xd02   :  { %v2908_v39 = vadd.f32 %v2907_v33, %v2335_v38  ;;  %v2337_v40 = vpop.f32.mrb[38].mxu1 }
 0xd03   :  { %v2340_v46 = vmax.f32 %v2906_v37, 0.0  ;;  %v2338_v35 = vpop.f32.mrb[39].mxu1 }
 0xd04   :  { %v2341_v41 = vmax.f32 %v2908_v39, 0.0 }
 0xd05   :  { %v2342_v34 = vpack.c.bf16 %v2340_v46, %v2340_v46 }
 0xd06   :  { %v2343_v42 = vpack.c.bf16 %v2341_v41, %v2341_v41 }
 0xd08   :  { %2511 = vmatprep.mubr.bf16.mxu0 %v2343_v42 }
 0xd09   :  { %2512 = vmatmul.mubr.bf16.vlgmr.msra.gmra.mrb[28].mxu0 %v2342_v34 }
 0xd0a   :  { %2901 = vmatprep.mubr.msk.bf16.mxu0 %vm3281_vm0, %v3280_v1  ;;  %v2526_v1 = vpop.permute.xlu1 %2525  ;;  %vm2585_vm0 = vcmask 64512  }
 0xd0b   :  { %v2531_v15 = vrot.slane %v2526_v1, %v3456_v32 }
 0xddc   :  { %v2833_v43 = vpop.f32.mrb[28].mxu0 }
 0xddd   :  { %v2834_v44 = vpop.f32.mrb[29].mxu0 }
 0xdde   :  { %v2835_v45 = vadd.f32 %v2834_v44, %v2833_v43  ;;  %v2836_v47 = vpop.f32.mrb[30].mxu0 }
 0xddf   :  { %v2837_v48 = vpop.f32.mrb[31].mxu0 }
 0xde0   :  { %v2514_v49 = vadd.f32 %v2835_v45, %v2772_v29 }
 0xde2   :  { %v2519_v50 = vmax.f32 %v2514_v49, 0.0 }
 0xde4   :  { %v2521_v24 = vpack.c.bf16 %v2519_v50, %v2519_v50 }
 0xde6   :  { %v2537_v51 = vsel %vm2532_vm1, %v2521_v24, 0 }
 0xde7   :  { %2900 = vmatpush3.bf16.xpose.msra.mxu0 %v2537_v51 }
 0xdee   :  { %2902 = vmatmul.mubr.msk.bf16.vlgmr.msra.gmra.mrb[32].mxu0 %vm2532_vm1, %v2520_v52 }
 0xec1   :  { %v2573_v54 = vpop.f32.mrb[32].mxu0 }
 0xec2   :  { %v2574_v55 = vadd.f32 %v2573_v54, %v2531_v15  ;;  %v2903_v56 = vpop.f32.mrb[33].mxu0 }
 0xec3   :  { %v2576_v9 = vpop.f32.mrb[34].mxu0 }
 0xec4   :  { %v2790_v57 = vmul.f32 -1.442695, %v2574_v55  ;;  %v2904_v58 = vpop.f32.mrb[35].mxu0 }
 0xec6   :  { %3225 = vpow2.f32 %v2790_v57 }
 0xed0   :  { %v3226_v61 = vpop.eup %3225 }
 0xed1   :  { %v2582_v21 = vadd.f32 1.0, %v3226_v61 }
 0xed3   :  { %3227 = vrcp.f32 %v2582_v21 }
 0xedd   :  { %v3228_v59 = vpop.eup %3227 }
 0xede   :  { %v2586_v60 = vsel %vm2585_vm0, %v3228_v59, 0.0 }
 0xedf   :  { %2587 = vst [vmem:[#allocation6] sm:$0x1] %v2586_v60 }
 0xee0   :  { %3262 = shalt.err (!%p3259_p12)
}
 0xee1   :  { %s3263_s4 = scalar_lea.hbm %s3764_s18, 16 }
 0xee2   :  { %p3264_p13 = scmp.ne.s32.totalorder %s3764_s18, %s3263_s4  ;;  %p3267_p0 = scmp.lt.u32.totalorder %s3263_s4, %s3764_s18 }
 0xee4   :  { %p3269_p1 = pnand %p3267_p0, %p3264_p13 }
 0xee6   :  { %3272 = shalt.err (!%p3269_p1)
}
 0xee7   :  { %2597 = dma.vmem_to_hbm [thread:$0]  %s2595_s21, 16, %s3764_s18, [#allocation5]  }
 0xee8   :  { %3275 = dma.done.wait [#allocation5], 16  }
 0xee9   :  { %3276 = vsyncadd [#allocation5], 4294967280 }
 0xeea   :  { %2601 = vsyncpa [#allocation4], 1 }
 0xeeb   :  { %2602 = vsyncpa [#allocation5], 1 }

</bundles_post_ra>
